<compile_context>
chip_gen: v5e
topology: v5e:2x2
jax: 0.10.0
libtpu: 0.0.40
codegen_flags: <defaults>
</compile_context>

<pallas_src>
import functools

import jax
import jax.numpy as jnp
from jax.experimental import pallas as pl
from jax.experimental.pallas import tpu as pltpu


def _trilerp_kernel(feat_ref, pts_ref, out_ref, *, res, feat_size):
    """One grid step: interpolate a lane-dense tile of points.

    feat_ref : (res*res*F, res)  feat_t[(iy*res + iz)*F + f, ix] = grid[ix,iy,iz,f]
    pts_ref  : (3, tn)           xyz on sublanes, points on lanes
    out_ref  : (F, tn)           lane-dense output tile
    """
    rf = res * feat_size                 # rows per y-slab after stage 1
    tn = pts_ref.shape[1]

    pts = pts_ref[...].astype(jnp.float32)            # (3, tn)
    p = (pts + 1.0) * 0.5                              # normalize to [0, 1]
    coord = p * jnp.float32(res - 1)
    c0f = jnp.floor(coord)
    frac = coord - c0f                                 # (3, tn)
    c0 = jnp.clip(c0f.astype(jnp.int32), 0, res - 1)
    c1 = jnp.clip(c0 + 1, 0, res - 1)

    iota_r = jax.lax.broadcasted_iota(jnp.int32, (res, tn), 0)

    def axis_weights(axis):
        i0 = c0[axis:axis + 1, :]                      # (1, tn)
        i1 = c1[axis:axis + 1, :]
        f1 = frac[axis:axis + 1, :]
        f0 = 1.0 - f1
        # One-hot-weighted rows; when i0 == i1 (clamped boundary) weights sum to 1,
        # matching the 8-corner reference exactly.
        return (jnp.where(iota_r == i0, f0, 0.0) +
                jnp.where(iota_r == i1, f1, 0.0))      # (res, tn)

    wx = axis_weights(0)
    wy = axis_weights(1)
    wz = axis_weights(2)

    feat = feat_ref[...].astype(jnp.float32)           # (res*res*F, res)

    # Stage 1: contract the x axis on the MXU (single matmul).
    # sx[(iy*res+iz)*F + f, n] = sum_ix grid[ix,iy,iz,f] * wx[ix, n]
    sx = jnp.dot(feat, wx, preferred_element_type=jnp.float32)   # (res*res*F, tn)

    # Stage 2: contract the y axis on the VPU (sublane-aligned static slices).
    sy = jnp.zeros((rf, tn), jnp.float32)
    for iy in range(res):
        sy = sy + wy[iy:iy + 1, :] * sx[iy * rf:(iy + 1) * rf, :]

    # Stage 3: contract the z axis on the VPU.
    out = jnp.zeros((feat_size, tn), jnp.float32)
    for iz in range(res):
        out = out + wz[iz:iz + 1, :] * sy[iz * feat_size:(iz + 1) * feat_size, :]

    out_ref[...] = out.astype(out_ref.dtype)           # (F, tn), lane-dense store


def single_lod_forward(features, pts, *, res, tn=256):
    """features: (res^3, F) float32; pts: (N, 3) float32 in [-1, 1]. Returns (N, F)."""
    n, _ = pts.shape
    r3, f = features.shape
    assert r3 == res ** 3

    # Pad the point count up to a multiple of the tile; padded rows are sliced off.
    n_pad = pl.cdiv(n, tn) * tn
    pts_pad = jnp.pad(pts, ((0, n_pad - n), (0, 0)))
    pts_t = pts_pad.T                                           # (3, n_pad) lane-dense
    # Rearrange the table so x is the matmul contraction axis (free reshape + one
    # small XLA transpose in the wrapper, done once).
    feat_t = features.reshape(res, res * res * f).T             # (res^2*F, res)

    kernel = functools.partial(_trilerp_kernel, res=res, feat_size=f)

    out_t = pl.pallas_call(
        kernel,
        out_shape=jax.ShapeDtypeStruct((f, n_pad), jnp.float32),
        grid_spec=pltpu.PrefetchScalarGridSpec(
            num_scalar_prefetch=0,
            grid=(n_pad // tn,),
            in_specs=[
                # Constant feature table: same block every step -> no re-DMA.
                pl.BlockSpec((res * res * f, res), lambda i: (0, 0)),
                # Point tile, points on lanes.
                pl.BlockSpec((3, tn), lambda i: (0, i)),
            ],
            out_specs=pl.BlockSpec((f, tn), lambda i: (0, i)),
        ),
        compiler_params=pltpu.CompilerParams(
            dimension_semantics=("parallel",),
        ),
    )(feat_t, pts_t)

    return out_t.T[:n]                                          # (N, F)


def reference_forward(features, pts, *, res):
    """Pure-JAX reference with identical semantics."""
    p = (pts + 1.0) * 0.5
    coord = p * (res - 1)
    c0f = jnp.floor(coord)
    frac = coord - c0f
    c0 = jnp.clip(c0f.astype(jnp.int32), 0, res - 1)
    c1 = jnp.clip(c0 + 1, 0, res - 1)
    fx, fy, fz = frac[:, 0:1], frac[:, 1:2], frac[:, 2:3]
    gx, gy, gz = 1.0 - fx, 1.0 - fy, 1.0 - fz

    def gather(ix, iy, iz):
        flat = ix * res * res + iy * res + iz
        return features[flat]

    x0, y0, z0 = c0[:, 0], c0[:, 1], c0[:, 2]
    x1, y1, z1 = c1[:, 0], c1[:, 1], c1[:, 2]
    out = (gx * gy * gz) * gather(x0, y0, z0)
    out += (gx * gy * fz) * gather(x0, y0, z1)
    out += (gx * fy * gz) * gather(x0, y1, z0)
    out += (gx * fy * fz) * gather(x0, y1, z1)
    out += (fx * gy * gz) * gather(x1, y0, z0)
    out += (fx * gy * fz) * gather(x1, y0, z1)
    out += (fx * fy * gz) * gather(x1, y1, z0)
    out += (fx * fy * fz) * gather(x1, y1, z1)
    return out


if __name__ == "__main__":
    # Small shapes consistent with the module (res=8, feature_size=8).
    RES = 8
    FEAT = 8
    N = 512          # = 2 * tn -> two parallel grid steps (uses both TCs on v7x)

    key = jax.random.PRNGKey(0)
    kf, kp = jax.random.split(key)

    # nn.init.normal_(std=0.01) on the (res^3, feature_size) feature grid.
    features = 0.01 * jax.random.normal(kf, (RES ** 3, FEAT), dtype=jnp.float32)
    # Query points in [-1, 1]^3, as the module's forward expects.
    pts = jax.random.uniform(kp, (N, 3), dtype=jnp.float32, minval=-1.0, maxval=1.0)

    out = single_lod_forward(features, pts, res=RES, tn=256)
    out = jax.block_until_ready(out)

    ref = reference_forward(features, pts, res=RES)
    assert out.shape == (N, FEAT)
    assert jnp.allclose(out, ref, atol=1e-5, rtol=1e-5), "mismatch vs reference"

    print("KERNEL_OK")
</pallas_src>

<mosaic_0001>
module attributes {stable_mosaic.version = 11 : i64} {
  func.func @_trilerp_kernel(%arg0: i32, %arg1: memref<512x8xf32, #tpu.memory_space<vmem>>, %arg2: memref<3x256xf32, #tpu.memory_space<vmem>>, %arg3: memref<8x256xf32, #tpu.memory_space<vmem>>) attributes {dimension_semantics = [#tpu.dimension_semantics<parallel>], iteration_bounds = array<i64: 2>, scalar_prefetch = 0 : i64, scratch_operands = 0 : i64, tpu.core_type = #tpu.core_type<tc>, window_params = [{pipeline_mode = #tpu.pipeline_mode<synchronous>, transform_indices = @transform_0, window_bounds = array<i64: 512, 8>}, {transform_indices = @transform_1, window_bounds = array<i64: 3, 256>}, {transform_indices = @transform_2, window_bounds = array<i64: 8, 256>}]} {
    %c0 = arith.constant 0 : index
    %c0_0 = arith.constant 0 : index
    %0 = vector.load %arg2[%c0, %c0_0] : memref<3x256xf32, #tpu.memory_space<vmem>>, vector<3x256xf32>
    %cst = arith.constant 1.000000e+00 : f32
    %1 = vector.broadcast %cst : f32 to vector<3x256xf32>
    %2 = arith.addf %0, %1 : vector<3x256xf32>
    %cst_1 = arith.constant 5.000000e-01 : f32
    %3 = vector.broadcast %cst_1 : f32 to vector<3x256xf32>
    %4 = arith.mulf %2, %3 : vector<3x256xf32>
    %cst_2 = arith.constant 7.000000e+00 : f32
    %5 = vector.broadcast %cst_2 : f32 to vector<3x256xf32>
    %6 = arith.mulf %4, %5 : vector<3x256xf32>
    %7 = math.floor %6 : vector<3x256xf32>
    %8 = arith.subf %6, %7 : vector<3x256xf32>
    %9 = arith.fptosi %7 : vector<3x256xf32> to vector<3x256xi32>
    %c0_i32 = arith.constant 0 : i32
    %c7_i32 = arith.constant 7 : i32
    %10 = vector.broadcast %c0_i32 : i32 to vector<3x256xi32>
    %11 = arith.maxsi %10, %9 : vector<3x256xi32>
    %12 = vector.broadcast %c7_i32 : i32 to vector<3x256xi32>
    %13 = arith.minsi %12, %11 : vector<3x256xi32>
    %c1_i32 = arith.constant 1 : i32
    %14 = vector.broadcast %c1_i32 : i32 to vector<3x256xi32>
    %15 = arith.addi %13, %14 : vector<3x256xi32>
    %c0_i32_3 = arith.constant 0 : i32
    %c7_i32_4 = arith.constant 7 : i32
    %16 = vector.broadcast %c0_i32_3 : i32 to vector<3x256xi32>
    %17 = arith.maxsi %16, %15 : vector<3x256xi32>
    %18 = vector.broadcast %c7_i32_4 : i32 to vector<3x256xi32>
    %19 = arith.minsi %18, %17 : vector<3x256xi32>
    %20 = tpu.iota {dimensions = array<i32: 0>} : vector<8x256xi32>
    %21 = vector.extract_strided_slice %13 {offsets = [0, 0], sizes = [1, 256], strides = [1, 1]} : vector<3x256xi32> to vector<1x256xi32>
    %22 = vector.extract_strided_slice %19 {offsets = [0, 0], sizes = [1, 256], strides = [1, 1]} : vector<3x256xi32> to vector<1x256xi32>
    %23 = vector.extract_strided_slice %8 {offsets = [0, 0], sizes = [1, 256], strides = [1, 1]} : vector<3x256xf32> to vector<1x256xf32>
    %cst_5 = arith.constant 1.000000e+00 : f32
    %24 = vector.broadcast %cst_5 : f32 to vector<1x256xf32>
    %25 = arith.subf %24, %23 : vector<1x256xf32>
    %26 = vector.broadcast %21 : vector<1x256xi32> to vector<8x256xi32>
    %27 = arith.cmpi eq, %20, %26 : vector<8x256xi32>
    %cst_6 = arith.constant 0.000000e+00 : f32
    %28 = vector.shape_cast %25 : vector<1x256xf32> to vector<1x256xf32>
    %29 = vector.broadcast %28 : vector<1x256xf32> to vector<8x256xf32>
    %30 = vector.broadcast %cst_6 : f32 to vector<8x256xf32>
    %31 = arith.select %27, %29, %30 : vector<8x256xi1>, vector<8x256xf32>
    %32 = vector.broadcast %22 : vector<1x256xi32> to vector<8x256xi32>
    %33 = arith.cmpi eq, %20, %32 : vector<8x256xi32>
    %cst_7 = arith.constant 0.000000e+00 : f32
    %34 = vector.shape_cast %23 : vector<1x256xf32> to vector<1x256xf32>
    %35 = vector.broadcast %34 : vector<1x256xf32> to vector<8x256xf32>
    %36 = vector.broadcast %cst_7 : f32 to vector<8x256xf32>
    %37 = arith.select %33, %35, %36 : vector<8x256xi1>, vector<8x256xf32>
    %38 = arith.addf %31, %37 : vector<8x256xf32>
    %39 = vector.extract_strided_slice %13 {offsets = [1, 0], sizes = [1, 256], strides = [1, 1]} : vector<3x256xi32> to vector<1x256xi32>
    %40 = vector.extract_strided_slice %19 {offsets = [1, 0], sizes = [1, 256], strides = [1, 1]} : vector<3x256xi32> to vector<1x256xi32>
    %41 = vector.extract_strided_slice %8 {offsets = [1, 0], sizes = [1, 256], strides = [1, 1]} : vector<3x256xf32> to vector<1x256xf32>
    %cst_8 = arith.constant 1.000000e+00 : f32
    %42 = vector.broadcast %cst_8 : f32 to vector<1x256xf32>
    %43 = arith.subf %42, %41 : vector<1x256xf32>
    %44 = vector.broadcast %39 : vector<1x256xi32> to vector<8x256xi32>
    %45 = arith.cmpi eq, %20, %44 : vector<8x256xi32>
    %cst_9 = arith.constant 0.000000e+00 : f32
    %46 = vector.shape_cast %43 : vector<1x256xf32> to vector<1x256xf32>
    %47 = vector.broadcast %46 : vector<1x256xf32> to vector<8x256xf32>
    %48 = vector.broadcast %cst_9 : f32 to vector<8x256xf32>
    %49 = arith.select %45, %47, %48 : vector<8x256xi1>, vector<8x256xf32>
    %50 = vector.broadcast %40 : vector<1x256xi32> to vector<8x256xi32>
    %51 = arith.cmpi eq, %20, %50 : vector<8x256xi32>
    %cst_10 = arith.constant 0.000000e+00 : f32
    %52 = vector.shape_cast %41 : vector<1x256xf32> to vector<1x256xf32>
    %53 = vector.broadcast %52 : vector<1x256xf32> to vector<8x256xf32>
    %54 = vector.broadcast %cst_10 : f32 to vector<8x256xf32>
    %55 = arith.select %51, %53, %54 : vector<8x256xi1>, vector<8x256xf32>
    %56 = arith.addf %49, %55 : vector<8x256xf32>
    %57 = vector.extract_strided_slice %13 {offsets = [2, 0], sizes = [1, 256], strides = [1, 1]} : vector<3x256xi32> to vector<1x256xi32>
    %58 = vector.extract_strided_slice %19 {offsets = [2, 0], sizes = [1, 256], strides = [1, 1]} : vector<3x256xi32> to vector<1x256xi32>
    %59 = vector.extract_strided_slice %8 {offsets = [2, 0], sizes = [1, 256], strides = [1, 1]} : vector<3x256xf32> to vector<1x256xf32>
    %cst_11 = arith.constant 1.000000e+00 : f32
    %60 = vector.broadcast %cst_11 : f32 to vector<1x256xf32>
    %61 = arith.subf %60, %59 : vector<1x256xf32>
    %62 = vector.broadcast %57 : vector<1x256xi32> to vector<8x256xi32>
    %63 = arith.cmpi eq, %20, %62 : vector<8x256xi32>
    %cst_12 = arith.constant 0.000000e+00 : f32
    %64 = vector.shape_cast %61 : vector<1x256xf32> to vector<1x256xf32>
    %65 = vector.broadcast %64 : vector<1x256xf32> to vector<8x256xf32>
    %66 = vector.broadcast %cst_12 : f32 to vector<8x256xf32>
    %67 = arith.select %63, %65, %66 : vector<8x256xi1>, vector<8x256xf32>
    %68 = vector.broadcast %58 : vector<1x256xi32> to vector<8x256xi32>
    %69 = arith.cmpi eq, %20, %68 : vector<8x256xi32>
    %cst_13 = arith.constant 0.000000e+00 : f32
    %70 = vector.shape_cast %59 : vector<1x256xf32> to vector<1x256xf32>
    %71 = vector.broadcast %70 : vector<1x256xf32> to vector<8x256xf32>
    %72 = vector.broadcast %cst_13 : f32 to vector<8x256xf32>
    %73 = arith.select %69, %71, %72 : vector<8x256xi1>, vector<8x256xf32>
    %74 = arith.addf %67, %73 : vector<8x256xf32>
    %c0_14 = arith.constant 0 : index
    %c0_15 = arith.constant 0 : index
    %75 = vector.load %arg1[%c0_14, %c0_15] : memref<512x8xf32, #tpu.memory_space<vmem>>, vector<512x8xf32>
    %cst_16 = arith.constant dense<0.000000e+00> : vector<512x256xf32>
    %76 = tpu.matmul %75, %38, %cst_16 {dimension_numbers = #tpu.dot_dimension_numbers<[1], [0], [0], [1], [0, 0, 1, 1], [], []>} : vector<512x8xf32>, vector<8x256xf32>, vector<512x256xf32> -> vector<512x256xf32>
    %cst_17 = arith.constant 0.000000e+00 : f32
    %77 = vector.broadcast %cst_17 : f32 to vector<64x256xf32>
    %78 = vector.extract_strided_slice %56 {offsets = [0, 0], sizes = [1, 256], strides = [1, 1]} : vector<8x256xf32> to vector<1x256xf32>
    %79 = vector.extract_strided_slice %76 {offsets = [0, 0], sizes = [64, 256], strides = [1, 1]} : vector<512x256xf32> to vector<64x256xf32>
    %80 = vector.broadcast %78 : vector<1x256xf32> to vector<64x256xf32>
    %81 = arith.mulf %80, %79 : vector<64x256xf32>
    %82 = arith.addf %77, %81 : vector<64x256xf32>
    %83 = vector.extract_strided_slice %56 {offsets = [1, 0], sizes = [1, 256], strides = [1, 1]} : vector<8x256xf32> to vector<1x256xf32>
    %84 = vector.extract_strided_slice %76 {offsets = [64, 0], sizes = [64, 256], strides = [1, 1]} : vector<512x256xf32> to vector<64x256xf32>
    %85 = vector.broadcast %83 : vector<1x256xf32> to vector<64x256xf32>
    %86 = arith.mulf %85, %84 : vector<64x256xf32>
    %87 = arith.addf %82, %86 : vector<64x256xf32>
    %88 = vector.extract_strided_slice %56 {offsets = [2, 0], sizes = [1, 256], strides = [1, 1]} : vector<8x256xf32> to vector<1x256xf32>
    %89 = vector.extract_strided_slice %76 {offsets = [128, 0], sizes = [64, 256], strides = [1, 1]} : vector<512x256xf32> to vector<64x256xf32>
    %90 = vector.broadcast %88 : vector<1x256xf32> to vector<64x256xf32>
    %91 = arith.mulf %90, %89 : vector<64x256xf32>
    %92 = arith.addf %87, %91 : vector<64x256xf32>
    %93 = vector.extract_strided_slice %56 {offsets = [3, 0], sizes = [1, 256], strides = [1, 1]} : vector<8x256xf32> to vector<1x256xf32>
    %94 = vector.extract_strided_slice %76 {offsets = [192, 0], sizes = [64, 256], strides = [1, 1]} : vector<512x256xf32> to vector<64x256xf32>
    %95 = vector.broadcast %93 : vector<1x256xf32> to vector<64x256xf32>
    %96 = arith.mulf %95, %94 : vector<64x256xf32>
    %97 = arith.addf %92, %96 : vector<64x256xf32>
    %98 = vector.extract_strided_slice %56 {offsets = [4, 0], sizes = [1, 256], strides = [1, 1]} : vector<8x256xf32> to vector<1x256xf32>
    %99 = vector.extract_strided_slice %76 {offsets = [256, 0], sizes = [64, 256], strides = [1, 1]} : vector<512x256xf32> to vector<64x256xf32>
    %100 = vector.broadcast %98 : vector<1x256xf32> to vector<64x256xf32>
    %101 = arith.mulf %100, %99 : vector<64x256xf32>
    %102 = arith.addf %97, %101 : vector<64x256xf32>
    %103 = vector.extract_strided_slice %56 {offsets = [5, 0], sizes = [1, 256], strides = [1, 1]} : vector<8x256xf32> to vector<1x256xf32>
    %104 = vector.extract_strided_slice %76 {offsets = [320, 0], sizes = [64, 256], strides = [1, 1]} : vector<512x256xf32> to vector<64x256xf32>
    %105 = vector.broadcast %103 : vector<1x256xf32> to vector<64x256xf32>
    %106 = arith.mulf %105, %104 : vector<64x256xf32>
    %107 = arith.addf %102, %106 : vector<64x256xf32>
    %108 = vector.extract_strided_slice %56 {offsets = [6, 0], sizes = [1, 256], strides = [1, 1]} : vector<8x256xf32> to vector<1x256xf32>
    %109 = vector.extract_strided_slice %76 {offsets = [384, 0], sizes = [64, 256], strides = [1, 1]} : vector<512x256xf32> to vector<64x256xf32>
    %110 = vector.broadcast %108 : vector<1x256xf32> to vector<64x256xf32>
    %111 = arith.mulf %110, %109 : vector<64x256xf32>
    %112 = arith.addf %107, %111 : vector<64x256xf32>
    %113 = vector.extract_strided_slice %56 {offsets = [7, 0], sizes = [1, 256], strides = [1, 1]} : vector<8x256xf32> to vector<1x256xf32>
    %114 = vector.extract_strided_slice %76 {offsets = [448, 0], sizes = [64, 256], strides = [1, 1]} : vector<512x256xf32> to vector<64x256xf32>
    %115 = vector.broadcast %113 : vector<1x256xf32> to vector<64x256xf32>
    %116 = arith.mulf %115, %114 : vector<64x256xf32>
    %117 = arith.addf %112, %116 : vector<64x256xf32>
    %cst_18 = arith.constant 0.000000e+00 : f32
    %118 = vector.broadcast %cst_18 : f32 to vector<8x256xf32>
    %119 = vector.extract_strided_slice %74 {offsets = [0, 0], sizes = [1, 256], strides = [1, 1]} : vector<8x256xf32> to vector<1x256xf32>
    %120 = vector.extract_strided_slice %117 {offsets = [0, 0], sizes = [8, 256], strides = [1, 1]} : vector<64x256xf32> to vector<8x256xf32>
    %121 = vector.broadcast %119 : vector<1x256xf32> to vector<8x256xf32>
    %122 = arith.mulf %121, %120 : vector<8x256xf32>
    %123 = arith.addf %118, %122 : vector<8x256xf32>
    %124 = vector.extract_strided_slice %74 {offsets = [1, 0], sizes = [1, 256], strides = [1, 1]} : vector<8x256xf32> to vector<1x256xf32>
    %125 = vector.extract_strided_slice %117 {offsets = [8, 0], sizes = [8, 256], strides = [1, 1]} : vector<64x256xf32> to vector<8x256xf32>
    %126 = vector.broadcast %124 : vector<1x256xf32> to vector<8x256xf32>
    %127 = arith.mulf %126, %125 : vector<8x256xf32>
    %128 = arith.addf %123, %127 : vector<8x256xf32>
    %129 = vector.extract_strided_slice %74 {offsets = [2, 0], sizes = [1, 256], strides = [1, 1]} : vector<8x256xf32> to vector<1x256xf32>
    %130 = vector.extract_strided_slice %117 {offsets = [16, 0], sizes = [8, 256], strides = [1, 1]} : vector<64x256xf32> to vector<8x256xf32>
    %131 = vector.broadcast %129 : vector<1x256xf32> to vector<8x256xf32>
    %132 = arith.mulf %131, %130 : vector<8x256xf32>
    %133 = arith.addf %128, %132 : vector<8x256xf32>
    %134 = vector.extract_strided_slice %74 {offsets = [3, 0], sizes = [1, 256], strides = [1, 1]} : vector<8x256xf32> to vector<1x256xf32>
    %135 = vector.extract_strided_slice %117 {offsets = [24, 0], sizes = [8, 256], strides = [1, 1]} : vector<64x256xf32> to vector<8x256xf32>
    %136 = vector.broadcast %134 : vector<1x256xf32> to vector<8x256xf32>
    %137 = arith.mulf %136, %135 : vector<8x256xf32>
    %138 = arith.addf %133, %137 : vector<8x256xf32>
    %139 = vector.extract_strided_slice %74 {offsets = [4, 0], sizes = [1, 256], strides = [1, 1]} : vector<8x256xf32> to vector<1x256xf32>
    %140 = vector.extract_strided_slice %117 {offsets = [32, 0], sizes = [8, 256], strides = [1, 1]} : vector<64x256xf32> to vector<8x256xf32>
    %141 = vector.broadcast %139 : vector<1x256xf32> to vector<8x256xf32>
    %142 = arith.mulf %141, %140 : vector<8x256xf32>
    %143 = arith.addf %138, %142 : vector<8x256xf32>
    %144 = vector.extract_strided_slice %74 {offsets = [5, 0], sizes = [1, 256], strides = [1, 1]} : vector<8x256xf32> to vector<1x256xf32>
    %145 = vector.extract_strided_slice %117 {offsets = [40, 0], sizes = [8, 256], strides = [1, 1]} : vector<64x256xf32> to vector<8x256xf32>
    %146 = vector.broadcast %144 : vector<1x256xf32> to vector<8x256xf32>
    %147 = arith.mulf %146, %145 : vector<8x256xf32>
    %148 = arith.addf %143, %147 : vector<8x256xf32>
    %149 = vector.extract_strided_slice %74 {offsets = [6, 0], sizes = [1, 256], strides = [1, 1]} : vector<8x256xf32> to vector<1x256xf32>
    %150 = vector.extract_strided_slice %117 {offsets = [48, 0], sizes = [8, 256], strides = [1, 1]} : vector<64x256xf32> to vector<8x256xf32>
    %151 = vector.broadcast %149 : vector<1x256xf32> to vector<8x256xf32>
    %152 = arith.mulf %151, %150 : vector<8x256xf32>
    %153 = arith.addf %148, %152 : vector<8x256xf32>
    %154 = vector.extract_strided_slice %74 {offsets = [7, 0], sizes = [1, 256], strides = [1, 1]} : vector<8x256xf32> to vector<1x256xf32>
    %155 = vector.extract_strided_slice %117 {offsets = [56, 0], sizes = [8, 256], strides = [1, 1]} : vector<64x256xf32> to vector<8x256xf32>
    %156 = vector.broadcast %154 : vector<1x256xf32> to vector<8x256xf32>
    %157 = arith.mulf %156, %155 : vector<8x256xf32>
    %158 = arith.addf %153, %157 : vector<8x256xf32>
    %c0_19 = arith.constant 0 : index
    %c0_20 = arith.constant 0 : index
    %159 = vector.load %arg3[%c0_19, %c0_20] : memref<8x256xf32, #tpu.memory_space<vmem>>, vector<8x256xf32>
    tpu.vector_store %arg3[%c0_19, %c0_20], %158 {strides = array<i32>} : memref<8x256xf32, #tpu.memory_space<vmem>>, vector<8x256xf32>,
    return
  }
  func.func @transform_0(%arg0: i32) -> (i32, i32) {
    %c0_i32 = arith.constant 0 : i32
    %c0_i32_0 = arith.constant 0 : i32
    %c0_i32_1 = arith.constant 0 : i32
    return %c0_i32, %c0_i32_0 : i32, i32
  }
  func.func @transform_1(%arg0: i32) -> (i32, i32) {
    %c0_i32 = arith.constant 0 : i32
    %c0_i32_0 = arith.constant 0 : i32
    return %c0_i32, %arg0 : i32, i32
  }
  func.func @transform_2(%arg0: i32) -> (i32, i32) {
    %c0_i32 = arith.constant 0 : i32
    %c0_i32_0 = arith.constant 0 : i32
    return %c0_i32, %arg0 : i32, i32
  }
}

</mosaic_0001>

<bundles_post_ra>
// kernel: tpu_custom_call.1
= control target key start
LH: loop header
LB: loop body
LE: loop exit
PB: predicated region body
PF: predicated region fallthrough
CT: control target
= control target key end

     0   :  { %7 = vsyncpa [#allocation3], 0  ;;  %s2536_s0 = inlined_call_operand.vmem [shape: f32[512,8], index: 0, kind: input, shape index: {}]   ;;  %s2537_s1 = inlined_call_operand.vmem [shape: f32[3,512], index: 1, kind: input, shape index: {}]   ;;  %s2538_s2 = inlined_call_operand.hbm [shape: f32[8,512], index: 2, kind: output, shape index: {}]  }
   0x1   :  { %9 = vsyncpa [#allocation3 + $0x1], 0  ;;  %s1592_s9 = smov 0   ;;  %s1594_s10 = smov 0  }
   0x2   :  { %s1596_s11 = smov 0   ;;  %s1598_s12 = smov 0  }
   0x3 LB: > { %s1613_s13 = sadd.s32 4294967295, %s1575_s12   ;;  %s1329_s14 = sadd.s32 4294967294, %s1575_s12   ;;  %s1575_s12 = sphi %s1598_s12, %s2632_s12   ;;  %s1571_s11 = sphi %s1596_s11, %s2631_s11   ;;  %s1567_s10 = sphi %s1594_s10, %s2630_s10   ;;  %s1563_s9 = sphi %s1592_s9, %s2629_s9  }
   0x4   : > { %s1617_s15 = sadd.s32 1, %s1575_s12   ;;  %s69_s16 = sadd.s32 1, %s1571_s11 }
   0x5   : > { %s66_s17 = ssub.s32 %s1575_s12, %s1617_s15  ;;  %p79_p0 = scmp.ne.s32.totalorder %s1571_s11, %s1567_s10 }
   0x6   : > { %p67_p1 = scmp.eq.s32.totalorder %s66_s17, 0  ;;  %p80_p2 = scmp.eq.s32.totalorder %s1613_s13, 1 }
   0x7   : > { %p85_p3 = scmp.ne.s32.totalorder %s1567_s10, %s1563_s9  ;;  %p86_p4 = scmp.eq.s32.totalorder %s1329_s14, 1 }
   0x8   : > { %s1628_s18 = scalar_select %p67_p1, %s1571_s11, %s69_s16  }
   0x9   : > { %p1630_p5 = por %p80_p2, %p79_p0  ;;  %p1634_p6 = por %p86_p4, %p85_p3 }
   0xa   : > { %p1332_p7 = scmp.ge.s32.totalorder %s1575_s12, 1  ;;  %p116_p8 = scmp.lt.s32.totalorder %s1575_s12, 3 }
   0xc   : > { %p117_p9 = pnand %p1332_p7, %p116_p8 }
   0xe   : > { %120 = sbr.rel (%p117_p9) target bundleno = 449 (0x1c1), region = 28 }
  0x13   : > { %s1334_s21 = sshll.u32 %s1613_s13, 1  ;;  %v161_v9 = vlaneseq  ;;  %v256_v37 = vld [vmem:[%s2536_s0] sm:$0xff]  ;;  %vm320_vm8 = vcmask 64512   ;;  %v257_v39 = vld [vmem:[%s2536_s0 + $0x8] sm:$0xff]  ;;  %v258_v41 = vld [vmem:[%s2536_s0 + $0x10] sm:$0xff]  ;;  %s1469_s23 = sshll.u32 %s1613_s13, 4 }
  0x14   : > { %p139_p10 = scmp.lt.s32.totalorder %s1334_s21, 3  ;;  %v288_v38 = vld [vmem:[%s2536_s0 + $0x100] sm:$0xff]  ;;  %v289_v40 = vld [vmem:[%s2536_s0 + $0x108] sm:$0xff]  ;;  %v290_v42 = vld [vmem:[%s2536_s0 + $0x110] sm:$0xff]  ;;  %s1533_s6 = scalar_lea.hbm %s2538_s2, 32 }
  0x15   : > { %v1656_v16 = vshrl.u32 %v161_v9, 7  ;;  %v259_v43 = vld [vmem:[%s2536_s0 + $0x18] sm:$0xff]  ;;  %v260_v45 = vld [vmem:[%s2536_s0 + $0x20] sm:$0xff]  ;;  %v261_v47 = vld [vmem:[%s2536_s0 + $0x28] sm:$0xff] }
  0x16   : > { %s2634_s21 = smov (!%p139_p10, %s1334_s21), 3  ;;  %v291_v44 = vld [vmem:[%s2536_s0 + $0x118] sm:$0xff]  ;;  %v292_v46 = vld [vmem:[%s2536_s0 + $0x120] sm:$0xff]  ;;  %v293_v48 = vld [vmem:[%s2536_s0 + $0x128] sm:$0xff] }
  0x17   : > { %s1335_s22 = sshll.u32 %s2634_s21, 2  ;;  %v262_v49 = vld [vmem:[%s2536_s0 + $0x30] sm:$0xff]  ;;  %v263_v51 = vld [vmem:[%s2536_s0 + $0x38] sm:$0xff]  ;;  %v264_v53 = vld [vmem:[%s2536_s0 + $0x40] sm:$0xff]  ;;  %s135_s21 = sand.u32 1, %s1567_s10  }
  0x18   : > { %s142_s25 = scalar_lea.vmem %s2537_s1, %s1335_s22  ;;  %v294_v50 = vld [vmem:[%s2536_s0 + $0x130] sm:$0xff]  ;;  %v295_v52 = vld [vmem:[%s2536_s0 + $0x138] sm:$0xff]  ;;  %v296_v54 = vld [vmem:[%s2536_s0 + $0x140] sm:$0xff]  ;;  %s1333_s22 = sshll.u32 %s135_s21, 4 }
  0x19   : > { %v145_v0 = vld [vmem:[%s142_s25] sm:$0x77]  ;;  %v265_v55 = vld [vmem:[%s2536_s0 + $0x48] sm:$0xff]  ;;  %v266_v57 = vld [vmem:[%s2536_s0 + $0x50] sm:$0xff]  ;;  %s1265_s25 = scalar_lea.hbm %s2538_s2, %s1469_s23  ;;  %s137_s26 = scalar_lea.vmem [#allocation2], %s1333_s22 }
  0x1a   : > { %v146_v1 = vadd.f32 1.0, %v145_v0  ;;  %v297_v56 = vld [vmem:[%s2536_s0 + $0x148] sm:$0xff]  ;;  %v298_v58 = vld [vmem:[%s2536_s0 + $0x150] sm:$0xff]  ;;  %v267_v59 = vld [vmem:[%s2536_s0 + $0x58] sm:$0xff]  ;;  %s1267_s27 = sshll.u32 %s137_s26, 4  ;;  %s1269_s28 = sshll.u32 %s1265_s25, 4  ;;  %s1268_s27 = int_to_ptr.vmem [resolvable:$true] %s1267_s27  ;;  %s1270_s28 = int_to_ptr.hbm [resolvable:$true] %s1269_s28 }
  0x1b   : > { %v299_v60 = vld [vmem:[%s2536_s0 + $0x158] sm:$0xff]  ;;  %v268_v61 = vld [vmem:[%s2536_s0 + $0x60] sm:$0xff]  ;;  %v269_v63 = vld [vmem:[%s2536_s0 + $0x68] sm:$0xff]  ;;  %s1254_s29 = scalar_lea.sflag [#allocation3], %s135_s21  ;;  %s1527_s30 = sshra.s32 %s1270_s28, 4  ;;  %s1528_s30 = int_to_ptr.hbm [resolvable:$true] %s1527_s30 }
  0x1c   : > { %v147_v2 = vmul.f32 0.5, %v146_v1  ;;  %v300_v62 = vld [vmem:[%s2536_s0 + $0x160] sm:$0xff]  ;;  %v301_v0 = vld [vmem:[%s2536_s0 + $0x168] sm:$0xff]  ;;  %v270_v1 = vld [vmem:[%s2536_s0 + $0x70] sm:$0xff]  ;;  %s1529_s3 = scalar_lea.hbm %s1528_s30, 16  ;;  %p1534_p0 = scmp.lt.s32.totalorder %s1528_s30, %s2538_s2 }
  0x1d   : > { %v272_v9 = vld [vmem:[%s2536_s0 + $0x80] sm:$0xff]  ;;  %p1530_p11 = scmp.ne.s32.totalorder %s1528_s30, %s1529_s3  ;;  %p1535_p1 = scmp.lt.s32.totalorder %s1533_s6, %s1529_s3 }
  0x1e   : > { %v148_v3 = vmul.f32 7.0, %v147_v2  ;;  %v302_v2 = vld [vmem:[%s2536_s0 + $0x170] sm:$0xff] }
  0x1f   : > { %p1531_p12 = pnand %p1530_p11, %p1630_p5  ;;  %p1536_p2 = por %p1535_p1, %p1534_p0 }
  0x20   : > { %v149_v4 = vfloor.f32 %v148_v3 }
  0x21   : > { %p1532_p13 = pneg %p1531_p12 }
  0x22   : > { %v1644_v5 = vsub.f32 %v148_v3, %v149_v4  ;;  %v1473_v6 = vcvt.f32.s32 %v149_v4  ;;  %v271_v3 = vld [vmem:[%s2536_s0 + $0x78] sm:$0xff] }
  0x23   : > { %v303_v4 = vld [vmem:[%s2536_s0 + $0x178] sm:$0xff]  ;;  %p1537_p3 = pnand %p1536_p2, %p1532_p13 }
  0x24   : > { %vm152_vm0 = vcmp.gt.s32.totalorder %v1473_v6, 0  ;;  %v1647_v8 = vsub.f32 1.0, %v1644_v5  ;;  %v186_v20 = vperm.slane %v1644_v5, 0  ;;  %v187_v21 = vperm.slane %v1644_v5, 4 }
  0x25   : > { %v153_v7 = vsel %vm152_vm0, %v1473_v6, 0 }
  0x26   : > { %vm154_vm1 = vcmp.lt.s32.totalorder %v153_v7, 7  ;;  %v171_v14 = vperm.slane %v1647_v8, 0  ;;  %v172_v15 = vperm.slane %v1647_v8, 4  ;;  %v190_v27 = vperm.slane %v186_v20, 0 }
  0x27   : > { %v1649_v10 = vsel %vm154_vm1, %v153_v7, 7  ;;  %v191_v28 = vperm.slane %v187_v21, 0  ;;  %v274_v21 = vld [vmem:[%s2536_s0 + $0x90] sm:$0xff] }
  0x28   : > { %v156_v11 = vadd.s32 1, %v1649_v10  ;;  %v164_v12 = vperm.slane %v1649_v10, 0  ;;  %v165_v13 = vperm.slane %v1649_v10, 4  ;;  %v175_v23 = vperm.slane %v171_v14, 0  ;;  %v273_v14 = vld [vmem:[%s2536_s0 + $0x88] sm:$0xff] }
  0x29   : > { %v176_v24 = vperm.slane %v172_v15, 0 }
  0x2a   : > { %vm157_vm2 = vcmp.gt.s32.totalorder %v156_v11, 0  ;;  %v166_v17 = vperm.slane %v164_v12, 0  ;;  %v167_v18 = vperm.slane %v165_v13, 0 }
  0x2b   : > { %v158_v19 = vsel %vm157_vm2, %v156_v11, 0  ;;  %v304_v11 = vld [vmem:[%s2536_s0 + $0x180] sm:$0xff] }
  0x2c   : > { %vm159_vm3 = vcmp.lt.s32.totalorder %v158_v19, 7  ;;  %vm168_vm4 = vcmp.eq.s32.totalorder %v1656_v16, %v166_v17  ;;  %vm169_vm5 = vcmp.eq.s32.totalorder %v1656_v16, %v167_v18  ;;  %v305_v18 = vld [vmem:[%s2536_s0 + $0x188] sm:$0xff] }
  0x2d   : > { %v1660_v22 = vsel %vm159_vm3, %v158_v19, 7  ;;  %v177_v31 = vsel %vm168_vm4, %v175_v23, 0.0  ;;  %v178_v32 = vsel %vm169_vm5, %v176_v24, 0.0 }
  0x2e   : > { %v179_v25 = vperm.slane %v1660_v22, 0  ;;  %v180_v26 = vperm.slane %v1660_v22, 4 }
  0x30   : > { %v181_v29 = vperm.slane %v179_v25, 0  ;;  %v182_v30 = vperm.slane %v180_v26, 0  ;;  %v306_v25 = vld [vmem:[%s2536_s0 + $0x190] sm:$0xff] }
  0x32   : > { %vm183_vm6 = vcmp.eq.s32.totalorder %v1656_v16, %v181_v29  ;;  %vm184_vm7 = vcmp.eq.s32.totalorder %v1656_v16, %v182_v30 }
  0x33   : > { %v192_v33 = vsel %vm183_vm6, %v190_v27, 0.0  ;;  %v193_v34 = vsel %vm184_vm7, %v191_v28, 0.0  ;;  %v275_v28 = vld [vmem:[%s2536_s0 + $0x98] sm:$0xff] }
  0x34   : > { %v194_v35 = vadd.f32 %v192_v33, %v177_v31  ;;  %v195_v36 = vadd.f32 %v193_v34, %v178_v32  ;;  %v307_v31 = vld [vmem:[%s2536_s0 + $0x198] sm:$0xff]  ;;  %v276_v34 = vld [vmem:[%s2536_s0 + $0xa0] sm:$0xff] }
  0x36   : > { %528 = vmatpush.msra.mxu0 %v194_v35  ;;  %737 = vmatpush.msra.mxu1 %v195_v36 }
  0x37   : > { %1336 = vmatmul.msk.f32.vlgmr.msra.gmra.mxu0 %vm320_vm8, %v256_v37  ;;  %1400 = vmatmul.msk.f32.vlgmr.msra.gmra.mxu1 %vm320_vm8, %v256_v37  ;;  %v308_v37 = vld [vmem:[%s2536_s0 + $0x1a0] sm:$0xff] }
  0x38   : > { %1470 = vmatpush.msra.mxu2 %v194_v35  ;;  %1471 = vmatpush.msra.mxu3 %v195_v36 }
  0x39   : > { %1368 = vmatmul.msk.f32.vlgmr.msra.gmra.mxu2 %vm320_vm8, %v288_v38  ;;  %1432 = vmatmul.msk.f32.vlgmr.msra.gmra.mxu3 %vm320_vm8, %v288_v38 }
  0x3f   : > { %1337 = vmatmul.msk.f32.gmra.mxu0 %vm320_vm8, %v257_v39  ;;  %1401 = vmatmul.msk.f32.gmra.mxu1 %vm320_vm8, %v257_v39 }
  0x41   : > { %1369 = vmatmul.msk.f32.gmra.mxu2 %vm320_vm8, %v289_v40  ;;  %1433 = vmatmul.msk.f32.gmra.mxu3 %vm320_vm8, %v289_v40  ;;  %v277_v40 = vld [vmem:[%s2536_s0 + $0xa8] sm:$0xff] }
  0x47   : > { %1338 = vmatmul.msk.f32.gmra.mxu0 %vm320_vm8, %v258_v41  ;;  %1402 = vmatmul.msk.f32.gmra.mxu1 %vm320_vm8, %v258_v41 }
  0x49   : > { %1370 = vmatmul.msk.f32.gmra.mxu2 %vm320_vm8, %v290_v42  ;;  %1434 = vmatmul.msk.f32.gmra.mxu3 %vm320_vm8, %v290_v42 }
  0x4f   : > { %1339 = vmatmul.msk.f32.gmra.mxu0 %vm320_vm8, %v259_v43  ;;  %1403 = vmatmul.msk.f32.gmra.mxu1 %vm320_vm8, %v259_v43  ;;  %v309_v43 = vld [vmem:[%s2536_s0 + $0x1a8] sm:$0xff] }
  0x51   : > { %1371 = vmatmul.msk.f32.gmra.mxu2 %vm320_vm8, %v291_v44  ;;  %1435 = vmatmul.msk.f32.gmra.mxu3 %vm320_vm8, %v291_v44 }
  0x57   : > { %1340 = vmatmul.msk.f32.gmra.mxu0 %vm320_vm8, %v260_v45  ;;  %1404 = vmatmul.msk.f32.gmra.mxu1 %vm320_vm8, %v260_v45 }
  0x59   : > { %1372 = vmatmul.msk.f32.gmra.mxu2 %vm320_vm8, %v292_v46  ;;  %1436 = vmatmul.msk.f32.gmra.mxu3 %vm320_vm8, %v292_v46  ;;  %v278_v46 = vld [vmem:[%s2536_s0 + $0xb0] sm:$0xff] }
  0x5f   : > { %1341 = vmatmul.msk.f32.gmra.mxu0 %vm320_vm8, %v261_v47  ;;  %1405 = vmatmul.msk.f32.gmra.mxu1 %vm320_vm8, %v261_v47 }
  0x61   : > { %1373 = vmatmul.msk.f32.gmra.mxu2 %vm320_vm8, %v293_v48  ;;  %1437 = vmatmul.msk.f32.gmra.mxu3 %vm320_vm8, %v293_v48 }
  0x67   : > { %1342 = vmatmul.msk.f32.gmra.mxu0 %vm320_vm8, %v262_v49  ;;  %1406 = vmatmul.msk.f32.gmra.mxu1 %vm320_vm8, %v262_v49  ;;  %v310_v49 = vld [vmem:[%s2536_s0 + $0x1b0] sm:$0xff] }
  0x69   : > { %1374 = vmatmul.msk.f32.gmra.mxu2 %vm320_vm8, %v294_v50  ;;  %1438 = vmatmul.msk.f32.gmra.mxu3 %vm320_vm8, %v294_v50 }
  0x6f   : > { %1343 = vmatmul.msk.f32.gmra.mxu0 %vm320_vm8, %v263_v51  ;;  %1407 = vmatmul.msk.f32.gmra.mxu1 %vm320_vm8, %v263_v51 }
  0x71   : > { %1375 = vmatmul.msk.f32.gmra.mxu2 %vm320_vm8, %v295_v52  ;;  %1439 = vmatmul.msk.f32.gmra.mxu3 %vm320_vm8, %v295_v52  ;;  %v279_v52 = vld [vmem:[%s2536_s0 + $0xb8] sm:$0xff] }
  0x77   : > { %1344 = vmatmul.msk.f32.gmra.mxu0 %vm320_vm8, %v264_v53  ;;  %1408 = vmatmul.msk.f32.gmra.mxu1 %vm320_vm8, %v264_v53 }
  0x79   : > { %1376 = vmatmul.msk.f32.gmra.mxu2 %vm320_vm8, %v296_v54  ;;  %1440 = vmatmul.msk.f32.gmra.mxu3 %vm320_vm8, %v296_v54 }
  0x7f   : > { %1345 = vmatmul.msk.f32.gmra.mxu0 %vm320_vm8, %v265_v55  ;;  %1409 = vmatmul.msk.f32.gmra.mxu1 %vm320_vm8, %v265_v55  ;;  %v311_v55 = vld [vmem:[%s2536_s0 + $0x1b8] sm:$0xff] }
  0x81   : > { %1377 = vmatmul.msk.f32.gmra.mxu2 %vm320_vm8, %v297_v56  ;;  %1441 = vmatmul.msk.f32.gmra.mxu3 %vm320_vm8, %v297_v56 }
  0x87   : > { %1346 = vmatmul.msk.f32.gmra.mxu0 %vm320_vm8, %v266_v57  ;;  %1410 = vmatmul.msk.f32.gmra.mxu1 %vm320_vm8, %v266_v57 }
  0x89   : > { %1378 = vmatmul.msk.f32.gmra.mxu2 %vm320_vm8, %v298_v58  ;;  %1442 = vmatmul.msk.f32.gmra.mxu3 %vm320_vm8, %v298_v58  ;;  %v280_v58 = vld [vmem:[%s2536_s0 + $0xc0] sm:$0xff] }
  0x8f   : > { %1347 = vmatmul.msk.f32.gmra.mxu0 %vm320_vm8, %v267_v59  ;;  %1411 = vmatmul.msk.f32.gmra.mxu1 %vm320_vm8, %v267_v59 }
  0x91   : > { %1379 = vmatmul.msk.f32.gmra.mxu2 %vm320_vm8, %v299_v60  ;;  %1443 = vmatmul.msk.f32.gmra.mxu3 %vm320_vm8, %v299_v60 }
  0x97   : > { %1348 = vmatmul.msk.f32.gmra.mxu0 %vm320_vm8, %v268_v61  ;;  %1412 = vmatmul.msk.f32.gmra.mxu1 %vm320_vm8, %v268_v61  ;;  %v312_v61 = vld [vmem:[%s2536_s0 + $0x1c0] sm:$0xff] }
  0x99   : > { %1380 = vmatmul.msk.f32.gmra.mxu2 %vm320_vm8, %v300_v62  ;;  %1444 = vmatmul.msk.f32.gmra.mxu3 %vm320_vm8, %v300_v62 }
  0x9f   : > { %1349 = vmatmul.msk.f32.gmra.mxu0 %vm320_vm8, %v269_v63  ;;  %1413 = vmatmul.msk.f32.gmra.mxu1 %vm320_vm8, %v269_v63 }
  0xa1   : > { %1381 = vmatmul.msk.f32.gmra.mxu2 %vm320_vm8, %v301_v0  ;;  %1445 = vmatmul.msk.f32.gmra.mxu3 %vm320_vm8, %v301_v0  ;;  %v281_v0 = vld [vmem:[%s2536_s0 + $0xc8] sm:$0xff] }
  0xa7   : > { %1350 = vmatmul.msk.f32.gmra.mxu0 %vm320_vm8, %v270_v1  ;;  %1414 = vmatmul.msk.f32.gmra.mxu1 %vm320_vm8, %v270_v1 }
  0xa9   : > { %1382 = vmatmul.msk.f32.gmra.mxu2 %vm320_vm8, %v302_v2  ;;  %1446 = vmatmul.msk.f32.gmra.mxu3 %vm320_vm8, %v302_v2 }
  0xaf   : > { %1351 = vmatmul.msk.f32.gmra.mxu0 %vm320_vm8, %v271_v3  ;;  %1415 = vmatmul.msk.f32.gmra.mxu1 %vm320_vm8, %v271_v3  ;;  %v313_v3 = vld [vmem:[%s2536_s0 + $0x1c8] sm:$0xff] }
  0xb1   : > { %1383 = vmatmul.msk.f32.gmra.mxu2 %vm320_vm8, %v303_v4  ;;  %1447 = vmatmul.msk.f32.gmra.mxu3 %vm320_vm8, %v303_v4 }
  0xb4   : > { %v1828_v6 = vpop.f32.mrf.mxu0  ;;  %v1830_v7 = vpop.f32.mrf.mxu1 }
  0xb7   : > { %1352 = vmatmul.msk.f32.gmra.mxu0 %vm320_vm8, %v272_v9  ;;  %1416 = vmatmul.msk.f32.gmra.mxu1 %vm320_vm8, %v272_v9 }
  0xb9   : > { %1384 = vmatmul.msk.f32.gmra.mxu2 %vm320_vm8, %v304_v11  ;;  %1448 = vmatmul.msk.f32.gmra.mxu3 %vm320_vm8, %v304_v11  ;;  %v282_v11 = vld [vmem:[%s2536_s0 + $0xd0] sm:$0xff] }
  0xbc   : > { %v1842_v12 = vpop.f32.mrf.mxu0  ;;  %v1844_v13 = vpop.f32.mrf.mxu2 }
  0xbd   : > { %v1849_v15 = vpop.f32.mrf.mxu1  ;;  %v1851_v17 = vpop.f32.mrf.mxu3 }
  0xbf   : > { %1353 = vmatmul.msk.f32.gmra.mxu0 %vm320_vm8, %v273_v14  ;;  %1417 = vmatmul.msk.f32.gmra.mxu1 %vm320_vm8, %v273_v14 }
  0xc1   : > { %1385 = vmatmul.msk.f32.gmra.mxu2 %vm320_vm8, %v305_v18  ;;  %1449 = vmatmul.msk.f32.gmra.mxu3 %vm320_vm8, %v305_v18 }
  0xc4   : > { %v1860_v19 = vpop.f32.mrf.mxu0  ;;  %v1862_v20 = vpop.f32.mrf.mxu2 }
  0xc5   : > { %v1867_v23 = vpop.f32.mrf.mxu1  ;;  %v1869_v24 = vpop.f32.mrf.mxu3 }
  0xc7   : > { %1354 = vmatmul.msk.f32.gmra.mxu0 %vm320_vm8, %v274_v21  ;;  %1418 = vmatmul.msk.f32.gmra.mxu1 %vm320_vm8, %v274_v21  ;;  %v314_v21 = vld [vmem:[%s2536_s0 + $0x1d0] sm:$0xff] }
  0xc9   : > { %1386 = vmatmul.msk.f32.gmra.mxu2 %vm320_vm8, %v306_v25  ;;  %1450 = vmatmul.msk.f32.gmra.mxu3 %vm320_vm8, %v306_v25 }
  0xcc   : > { %v1878_v26 = vpop.f32.mrf.mxu0  ;;  %v1880_v27 = vpop.f32.mrf.mxu2 }
  0xcd   : > { %v1885_v29 = vpop.f32.mrf.mxu1  ;;  %v1887_v30 = vpop.f32.mrf.mxu3 }
  0xcf   : > { %1355 = vmatmul.msk.f32.gmra.mxu0 %vm320_vm8, %v275_v28  ;;  %1419 = vmatmul.msk.f32.gmra.mxu1 %vm320_vm8, %v275_v28 }
  0xd1   : > { %1387 = vmatmul.msk.f32.gmra.mxu2 %vm320_vm8, %v307_v31  ;;  %1451 = vmatmul.msk.f32.gmra.mxu3 %vm320_vm8, %v307_v31  ;;  %v283_v31 = vld [vmem:[%s2536_s0 + $0xd8] sm:$0xff] }
  0xd4   : > { %v1896_v32 = vpop.f32.mrf.mxu0  ;;  %v1898_v33 = vpop.f32.mrf.mxu2 }
  0xd5   : > { %2547 = vst [vmem:[#allocation5_spill] sm:$0xff] %v1898_v33  ;;  %v1903_v35 = vpop.f32.mrf.mxu1  ;;  %v1905_v36 = vpop.f32.mrf.mxu3 }
  0xd6   : > { %2548 = vst [vmem:[#allocation6_spill] sm:$0xff] %v1905_v36 }
  0xd7   : > { %1356 = vmatmul.msk.f32.gmra.mxu0 %vm320_vm8, %v276_v34  ;;  %1420 = vmatmul.msk.f32.gmra.mxu1 %vm320_vm8, %v276_v34 }
  0xd9   : > { %1388 = vmatmul.msk.f32.gmra.mxu2 %vm320_vm8, %v308_v37  ;;  %1452 = vmatmul.msk.f32.gmra.mxu3 %vm320_vm8, %v308_v37 }
  0xdc   : > { %v1914_v38 = vpop.f32.mrf.mxu0  ;;  %v1916_v39 = vpop.f32.mrf.mxu2 }
  0xdd   : > { %2549 = vst [vmem:[#allocation7_spill] sm:$0xff] %v1916_v39  ;;  %v1921_v41 = vpop.f32.mrf.mxu1  ;;  %v1923_v42 = vpop.f32.mrf.mxu3 }
  0xde   : > { %2550 = vst [vmem:[#allocation8_spill] sm:$0xff] %v1923_v42 }
  0xdf   : > { %1357 = vmatmul.msk.f32.gmra.mxu0 %vm320_vm8, %v277_v40  ;;  %1421 = vmatmul.msk.f32.gmra.mxu1 %vm320_vm8, %v277_v40  ;;  %v315_v40 = vld [vmem:[%s2536_s0 + $0x1d8] sm:$0xff] }
  0xe1   : > { %1389 = vmatmul.msk.f32.gmra.mxu2 %vm320_vm8, %v309_v43  ;;  %1453 = vmatmul.msk.f32.gmra.mxu3 %vm320_vm8, %v309_v43 }
  0xe4   : > { %v1932_v44 = vpop.f32.mrf.mxu0  ;;  %v1934_v45 = vpop.f32.mrf.mxu2 }
  0xe5   : > { %2551 = vst [vmem:[#allocation9_spill] sm:$0xff] %v1934_v45  ;;  %v1939_v47 = vpop.f32.mrf.mxu1  ;;  %v1941_v48 = vpop.f32.mrf.mxu3 }
  0xe6   : > { %2552 = vst [vmem:[#allocation10_spill] sm:$0xff] %v1941_v48  ;;  %v217_v48 = vperm.slane %v1644_v5, 5 }
  0xe7   : > { %1358 = vmatmul.msk.f32.gmra.mxu0 %vm320_vm8, %v278_v46  ;;  %1422 = vmatmul.msk.f32.gmra.mxu1 %vm320_vm8, %v278_v46 }
  0xe9   : > { %1390 = vmatmul.msk.f32.gmra.mxu2 %vm320_vm8, %v310_v49  ;;  %1454 = vmatmul.msk.f32.gmra.mxu3 %vm320_vm8, %v310_v49  ;;  %v284_v49 = vld [vmem:[%s2536_s0 + $0xe0] sm:$0xff] }
  0xec   : > { %v1950_v50 = vpop.f32.mrf.mxu0  ;;  %v1952_v51 = vpop.f32.mrf.mxu2 }
  0xed   : > { %2553 = vst [vmem:[#allocation11_spill] sm:$0xff] %v1950_v50  ;;  %v1957_v53 = vpop.f32.mrf.mxu1  ;;  %v1959_v54 = vpop.f32.mrf.mxu3  ;;  %v203_v50 = vperm.slane %v1647_v8, 5 }
  0xee   : > { %2554 = vst [vmem:[#allocation12_spill] sm:$0xff] %v1952_v51 }
  0xef   : > { %2555 = vst [vmem:[#allocation13_spill] sm:$0xff] %v1957_v53  ;;  %1359 = vmatmul.msk.f32.gmra.mxu0 %vm320_vm8, %v279_v52  ;;  %1423 = vmatmul.msk.f32.gmra.mxu1 %vm320_vm8, %v279_v52 }
  0xf0   : > { %2556 = vst [vmem:[#allocation14_spill] sm:$0xff] %v1959_v54  ;;  %v216_v54 = vperm.slane %v1644_v5, 1 }
  0xf1   : > { %1391 = vmatmul.msk.f32.gmra.mxu2 %vm320_vm8, %v311_v55  ;;  %1455 = vmatmul.msk.f32.gmra.mxu3 %vm320_vm8, %v311_v55 }
  0xf2   : > { %v220_v42 = vperm.slane %v216_v54, 1  ;;  %v318_v54 = vld [vmem:[%s2536_s0 + $0x1f0] sm:$0xff] }
  0xf4   : > { %v1968_v56 = vpop.f32.mrf.mxu0  ;;  %v1970_v57 = vpop.f32.mrf.mxu2 }
  0xf5   : > { %2557 = vst [vmem:[#allocation15_spill] sm:$0xff] %v1970_v57  ;;  %v1975_v59 = vpop.f32.mrf.mxu1  ;;  %v1977_v60 = vpop.f32.mrf.mxu3  ;;  %v202_v57 = vperm.slane %v1647_v8, 1 }
  0xf6   : > { %2558 = vst [vmem:[#allocation16_spill] sm:$0xff] %v1977_v60  ;;  %v317_v60 = vld [vmem:[%s2536_s0 + $0x1e8] sm:$0xff] }
  0xf7   : > { %1360 = vmatmul.msk.f32.gmra.mxu0 %vm320_vm8, %v280_v58  ;;  %1424 = vmatmul.msk.f32.gmra.mxu1 %vm320_vm8, %v280_v58  ;;  %v316_v58 = vld [vmem:[%s2536_s0 + $0x1e0] sm:$0xff] }
  0xf9   : > { %1392 = vmatmul.msk.f32.gmra.mxu2 %vm320_vm8, %v312_v61  ;;  %1456 = vmatmul.msk.f32.gmra.mxu3 %vm320_vm8, %v312_v61 }
  0xfc   : > { %v1986_v62 = vpop.f32.mrf.mxu0  ;;  %v1988_v63 = vpop.f32.mrf.mxu2 }
  0xfd   : > { %v1993_v1 = vpop.f32.mrf.mxu1  ;;  %v1995_v2 = vpop.f32.mrf.mxu3 }
  0xff   : > { %1361 = vmatmul.msk.f32.gmra.mxu0 %vm320_vm8, %v281_v0  ;;  %1425 = vmatmul.msk.f32.gmra.mxu1 %vm320_vm8, %v281_v0 }
 0x101   : > { %1393 = vmatmul.msk.f32.gmra.mxu2 %vm320_vm8, %v313_v3  ;;  %1457 = vmatmul.msk.f32.gmra.mxu3 %vm320_vm8, %v313_v3  ;;  %v285_v3 = vld [vmem:[%s2536_s0 + $0xe8] sm:$0xff] }
 0x104   : > { %v2004_v4 = vpop.f32.mrf.mxu0  ;;  %v2006_v9 = vpop.f32.mrf.mxu2 }
 0x105   : > { %v2011_v14 = vpop.f32.mrf.mxu1  ;;  %v2013_v18 = vpop.f32.mrf.mxu3 }
 0x107   : > { %1362 = vmatmul.msk.f32.gmra.mxu0 %vm320_vm8, %v282_v11  ;;  %1426 = vmatmul.msk.f32.gmra.mxu1 %vm320_vm8, %v282_v11  ;;  %v196_v11 = vperm.slane %v1649_v10, 1 }
 0x109   : > { %1394 = vmatmul.msk.f32.gmra.mxu2 %vm320_vm8, %v314_v21  ;;  %1458 = vmatmul.msk.f32.gmra.mxu3 %vm320_vm8, %v314_v21  ;;  %v210_v21 = vperm.slane %v1660_v22, 1  ;;  %v198_v53 = vperm.slane %v196_v11, 1  ;;  %v286_v11 = vld [vmem:[%s2536_s0 + $0xf0] sm:$0xff] }
 0x10b   : > { %v212_v51 = vperm.slane %v210_v21, 1  ;;  %vm200_vm9 = vcmp.eq.s32.totalorder %v1656_v16, %v198_v53  ;;  %v207_v21 = vperm.slane %v203_v50, 1 }
 0x10c   : > { %v2022_v25 = vpop.f32.mrf.mxu0  ;;  %v2024_v28 = vpop.f32.mrf.mxu2 }
 0x10d   : > { %v2029_v34 = vpop.f32.mrf.mxu1  ;;  %v2031_v37 = vpop.f32.mrf.mxu3  ;;  %vm214_vm10 = vcmp.eq.s32.totalorder %v1656_v16, %v212_v51 }
 0x10e   : > { %2559 = vst [vmem:[#allocation17_spill] sm:$0xff] %v2031_v37  ;;  %v222_v51 = vsel %vm214_vm10, %v220_v42, 0.0 }
 0x10f   : > { %1363 = vmatmul.msk.f32.gmra.mxu0 %vm320_vm8, %v283_v31  ;;  %1427 = vmatmul.msk.f32.gmra.mxu1 %vm320_vm8, %v283_v31 }
 0x111   : > { %1395 = vmatmul.msk.f32.gmra.mxu2 %vm320_vm8, %v315_v40  ;;  %1459 = vmatmul.msk.f32.gmra.mxu3 %vm320_vm8, %v315_v40 }
 0x114   : > { %v2040_v43 = vpop.f32.mrf.mxu0  ;;  %v2042_v46 = vpop.f32.mrf.mxu2 }
 0x115   : > { %2560 = vst [vmem:[#allocation18_spill] sm:$0xff] %v2042_v46  ;;  %v2047_v52 = vpop.f32.mrf.mxu1  ;;  %v2049_v55 = vpop.f32.mrf.mxu3 }
 0x116   : > { %2561 = vst [vmem:[#allocation19_spill] sm:$0xff] %v2049_v55  ;;  %v221_v55 = vperm.slane %v217_v48, 1 }
 0x117   : > { %1364 = vmatmul.msk.f32.gmra.mxu0 %vm320_vm8, %v284_v49  ;;  %1428 = vmatmul.msk.f32.gmra.mxu1 %vm320_vm8, %v284_v49  ;;  %v197_v49 = vperm.slane %v1649_v10, 5 }
 0x119   : > { %1396 = vmatmul.msk.f32.gmra.mxu2 %vm320_vm8, %v316_v58  ;;  %1460 = vmatmul.msk.f32.gmra.mxu3 %vm320_vm8, %v316_v58  ;;  %v211_v58 = vperm.slane %v1660_v22, 5  ;;  %v199_v45 = vperm.slane %v197_v49, 1 }
 0x11b   : > { %vm201_vm11 = vcmp.eq.s32.totalorder %v1656_v16, %v199_v45 }
 0x11c   : > { %v2058_v61 = vpop.f32.mrf.mxu0  ;;  %v2060_v0 = vpop.f32.mrf.mxu2  ;;  %v209_v50 = vsel %vm201_vm11, %v207_v21, 0.0  ;;  %v319_v21 = vld [vmem:[%s2536_s0 + $0x1f8] sm:$0xff] }
 0x11d   : > { %2562 = vst [vmem:[#allocation20_spill] sm:$0xff] %v2060_v0  ;;  %v2067_v31 = vpop.f32.mrf.mxu1  ;;  %v2069_v40 = vpop.f32.mrf.mxu3  ;;  %v206_v0 = vperm.slane %v202_v57, 1 }
 0x11e   : > { %2563 = vst [vmem:[#allocation21_spill] sm:$0xff] %v2069_v40  ;;  %v213_v40 = vperm.slane %v211_v58, 1  ;;  %v287_v58 = vld [vmem:[%s2536_s0 + $0xf8] sm:$0xff] }
 0x11f   : > { %1365 = vmatmul.msk.f32.gmra.mxu0 %vm320_vm8, %v285_v3  ;;  %1429 = vmatmul.msk.f32.gmra.mxu1 %vm320_vm8, %v285_v3  ;;  %v208_v53 = vsel %vm200_vm9, %v206_v0, 0.0 }
 0x120   : > { %vm215_vm12 = vcmp.eq.s32.totalorder %v1656_v16, %v213_v40  ;;  %v2106_v57 = vadd.f32 %v222_v51, %v208_v53 }
 0x121   : > { %1397 = vmatmul.msk.f32.gmra.mxu2 %vm320_vm8, %v317_v60  ;;  %1461 = vmatmul.msk.f32.gmra.mxu3 %vm320_vm8, %v317_v60  ;;  %v223_v48 = vsel %vm215_vm12, %v221_v55, 0.0 }
 0x122   : > { %v2108_v45 = vadd.f32 %v223_v48, %v209_v50  ;;  %v2118_v42 = vperm.slane %v2106_v57, 1  ;;  %v2143_v50 = vperm.slane %v2106_v57, 2 }
 0x124   : > { %v2084_v39 = vpop.f32.mrf.mxu0  ;;  %v2086_v3 = vpop.f32.mrf.mxu2  ;;  %2568 = vst [vmem:[#allocation26_spill] sm:$0xff] %v2118_v42  ;;  %v2136_v53 = vperm.slane %v2108_v45, 0  ;;  %v967_v51 = vmul.f32 %v2118_v42, %v1968_v56 }
 0x125   : > { %2564 = vst [vmem:[#allocation22_spill] sm:$0xff] %v2086_v3  ;;  %v2093_v46 = vpop.f32.mrf.mxu1  ;;  %v2095_v60 = vpop.f32.mrf.mxu3 }
 0x126   : > { %2565 = vst [vmem:[#allocation23_spill] sm:$0xff] %v2095_v60 }
 0x127   : > { %1366 = vmatmul.msk.f32.gmra.mxu0 %vm320_vm8, %v286_v11  ;;  %1430 = vmatmul.msk.f32.gmra.mxu1 %vm320_vm8, %v286_v11  ;;  %v2125_v11 = vperm.slane %v2108_v45, 1  ;;  %2573 = vst [vmem:[#allocation31_spill] sm:$0xff] %v2136_v53 }
 0x128   : > { %2574 = vst [vmem:[#allocation32_spill] sm:$0xff] %v2143_v50 }
 0x129   : > { %1398 = vmatmul.msk.f32.gmra.mxu2 %vm320_vm8, %v318_v54  ;;  %1462 = vmatmul.msk.f32.gmra.mxu3 %vm320_vm8, %v318_v54  ;;  %2571 = vst [vmem:[#allocation29_spill] sm:$0xff] %v2125_v11  ;;  %v2131_v54 = vperm.slane %v2106_v57, 0  ;;  %v968_v48 = vmul.f32 %v2125_v11, %v1975_v59 }
 0x12b   : > { %2572 = vst [vmem:[#allocation30_spill] sm:$0xff] %v2131_v54 }
 0x12c   : > { %v2110_v40 = vpop.f32.mrf.mxu0  ;;  %v2112_v49 = vpop.f32.mrf.mxu2 }
 0x12d   : > { %2566 = vst [vmem:[#allocation24_spill] sm:$0xff] %v2110_v40  ;;  %v2120_v55 = vpop.f32.mrf.mxu1  ;;  %v2122_v0 = vpop.f32.mrf.mxu3 }
 0x12e   : > { %2567 = vst [vmem:[#allocation25_spill] sm:$0xff] %v2112_v49  ;;  %v934_v49 = vmul.f32 %v2136_v53, %v1830_v7  ;;  %v970_v7 = vmul.f32 %v2125_v11, %v1993_v1 }
 0x12f   : > { %2569 = vst [vmem:[#allocation27_spill] sm:$0xff] %v2120_v55  ;;  %1367 = vmatmul.msk.f32.gmra.mxu0 %vm320_vm8, %v287_v58  ;;  %1431 = vmatmul.msk.f32.gmra.mxu1 %vm320_vm8, %v287_v58  ;;  %v933_v58 = vmul.f32 %v2131_v54, %v1828_v6  ;;  %v969_v6 = vmul.f32 %v2118_v42, %v1986_v62 }
 0x130   : > { %2570 = vst [vmem:[#allocation28_spill] sm:$0xff] %v2122_v0  ;;  %v2148_v0 = vperm.slane %v2108_v45, 2  ;;  %v984_v36 = vadd.f32 %v968_v48, %v934_v49 }
 0x131   : > { %1399 = vmatmul.msk.f32.gmra.mxu2 %vm320_vm8, %v319_v21  ;;  %1463 = vmatmul.msk.f32.gmra.mxu3 %vm320_vm8, %v319_v21  ;;  %v983_v40 = vadd.f32 %v967_v51, %v933_v58  ;;  %v935_v51 = vmul.f32 %v2131_v54, %v1842_v12  ;;  %v936_v58 = vmul.f32 %v2136_v53, %v1849_v15 }
 0x132   : > { %2575 = vst [vmem:[#allocation33_spill] sm:$0xff] %v2148_v0  ;;  %v971_v12 = vmul.f32 %v2118_v42, %v2004_v4  ;;  %v972_v15 = vmul.f32 %v2125_v11, %v2011_v14 }
 0x134   : > { %v578_v56 = vpop.f32.mrf.mxu0  ;;  %v2154_v55 = vpop.f32.mrf.mxu2 }
 0x135   : > { %2576 = vst [vmem:[#allocation34_spill] sm:$0xff] %v2154_v55  ;;  %v1001_v21 = vmul.f32 %v2143_v50, %v578_v56  ;;  %v787_v60 = vpop.f32.mrf.mxu1  ;;  %v2157_v3 = vpop.f32.mrf.mxu3 }
 0x136   : > { %2577 = vst [vmem:[#allocation35_spill] sm:$0xff] %v2157_v3  ;;  %v1002_v59 = vmul.f32 %v2148_v0, %v787_v60  ;;  %v985_v60 = vadd.f32 %v969_v6, %v935_v51  ;;  %v937_v6 = vmul.f32 %v2131_v54, %v1860_v19  ;;  %v938_v51 = vmul.f32 %v2136_v53, %v1867_v23 }
 0x137   : > { %v2160_v33 = vadd.f32 %v1001_v21, %v983_v40  ;;  %v986_v21 = vadd.f32 %v970_v7, %v936_v58  ;;  %v973_v19 = vmul.f32 %v2118_v42, %v2022_v25  ;;  %v974_v23 = vmul.f32 %v2125_v11, %v2029_v34 }
 0x138   : > { %v2162_v37 = vadd.f32 %v1002_v59, %v984_v36  ;;  %v987_v58 = vadd.f32 %v971_v12, %v937_v6  ;;  %v939_v12 = vmul.f32 %v2131_v54, %v1878_v26  ;;  %v940_v6 = vmul.f32 %v2136_v53, %v1885_v29 }
 0x139   : > { %v975_v26 = vmul.f32 %v2118_v42, %v2040_v43  ;;  %v976_v29 = vmul.f32 %v2125_v11, %v2047_v52 }
 0x13c   : > { %v581_v56 = vpop.f32.mrf.mxu0  ;;  %v2172_v49 = vpop.f32.mrf.mxu2 }
 0x13d   : > { %v1003_v40 = vmul.f32 %v2143_v50, %v581_v56  ;;  %v790_v36 = vpop.f32.mrf.mxu1  ;;  %v2175_v48 = vpop.f32.mrf.mxu3 }
 0x13e   : > { %v1004_v62 = vmul.f32 %v2148_v0, %v790_v36 }
 0x13f   : > { %v2178_v59 = vadd.f32 %v1003_v40, %v985_v60 }
 0x140   : > { %v2180_v1 = vadd.f32 %v1004_v62, %v986_v21  ;;  %v988_v21 = vadd.f32 %v972_v15, %v938_v51  ;;  %v989_v51 = vadd.f32 %v973_v19, %v939_v12  ;;  %v941_v19 = vmul.f32 %v2131_v54, %v1896_v32 }
 0x141   : > { %v942_v12 = vmul.f32 %v2136_v53, %v1903_v35  ;;  %v977_v32 = vmul.f32 %v2118_v42, %v2058_v61  ;;  %v978_v35 = vmul.f32 %v2125_v11, %v2067_v31 }
 0x144   : > { %v584_v56 = vpop.f32.mrf.mxu0  ;;  %v2190_v7 = vpop.f32.mrf.mxu2 }
 0x145   : > { %v1005_v60 = vmul.f32 %v2143_v50, %v584_v56  ;;  %v793_v40 = vpop.f32.mrf.mxu1  ;;  %v2193_v36 = vpop.f32.mrf.mxu3 }
 0x146   : > { %v1006_v4 = vmul.f32 %v2148_v0, %v793_v40 }
 0x147   : > { %v2196_v62 = vadd.f32 %v1005_v60, %v987_v58 }
 0x148   : > { %v2198_v14 = vadd.f32 %v1006_v4, %v988_v21  ;;  %v990_v21 = vadd.f32 %v974_v23, %v940_v6  ;;  %v991_v6 = vadd.f32 %v975_v26, %v941_v19  ;;  %v943_v26 = vmul.f32 %v2131_v54, %v1914_v38 }
 0x149   : > { %v944_v19 = vmul.f32 %v2136_v53, %v1921_v41  ;;  %v979_v38 = vmul.f32 %v2118_v42, %v2084_v39  ;;  %v980_v41 = vmul.f32 %v2125_v11, %v2093_v46 }
 0x14c   : > { %v587_v56 = vpop.f32.mrf.mxu0  ;;  %v2208_v15 = vpop.f32.mrf.mxu2 }
 0x14d   : > { %v1007_v58 = vmul.f32 %v2143_v50, %v587_v56  ;;  %v796_v60 = vpop.f32.mrf.mxu1  ;;  %v2211_v40 = vpop.f32.mrf.mxu3 }
 0x14e   : > { %v1008_v25 = vmul.f32 %v2148_v0, %v796_v60 }
 0x14f   : > { %v2214_v4 = vadd.f32 %v1007_v58, %v989_v51 }
 0x150   : > { %v2216_v34 = vadd.f32 %v1008_v25, %v990_v21  ;;  %v992_v21 = vadd.f32 %v976_v29, %v942_v12  ;;  %v993_v12 = vadd.f32 %v977_v32, %v943_v26  ;;  %v945_v32 = vmul.f32 %v2131_v54, %v1932_v44 }
 0x151   : > { %v946_v26 = vmul.f32 %v2136_v53, %v1939_v47  ;;  %v247_v53 = vperm.slane %v1644_v5, 6 }
 0x154   : > { %v590_v56 = vpop.f32.mrf.mxu0  ;;  %v2226_v23 = vpop.f32.mrf.mxu2 }
 0x155   : > { %v1009_v51 = vmul.f32 %v2143_v50, %v590_v56  ;;  %v799_v58 = vpop.f32.mrf.mxu1  ;;  %v2229_v60 = vpop.f32.mrf.mxu3 }
 0x156   : > { %v1010_v43 = vmul.f32 %v2148_v0, %v799_v58 }
 0x157   : > { %v2232_v25 = vadd.f32 %v1009_v51, %v991_v6 }
 0x158   : > { %v2234_v52 = vadd.f32 %v1010_v43, %v992_v21  ;;  %v994_v21 = vadd.f32 %v978_v35, %v944_v19  ;;  %v995_v19 = vadd.f32 %v979_v38, %v945_v32  ;;  %v2281_v38 = vperm.slane %v2106_v57, 4 }
 0x159   : > { %v2284_v32 = vperm.slane %v2108_v45, 4 }
 0x15c   : > { %v593_v56 = vpop.f32.mrf.mxu0  ;;  %v2244_v29 = vpop.f32.mrf.mxu2 }
 0x15d   : > { %v1011_v6 = vmul.f32 %v2143_v50, %v593_v56  ;;  %v802_v51 = vpop.f32.mrf.mxu1  ;;  %v2247_v58 = vpop.f32.mrf.mxu3 }
 0x15e   : > { %v1012_v61 = vmul.f32 %v2148_v0, %v802_v51 }
 0x15f   : > { %v2250_v43 = vadd.f32 %v1011_v6, %v993_v12 }
 0x160   : > { %v2252_v31 = vadd.f32 %v1012_v61, %v994_v21  ;;  %v996_v21 = vadd.f32 %v980_v41, %v946_v26  ;;  %v2287_v41 = vperm.slane %v2106_v57, 3  ;;  %v226_v26 = vperm.slane %v1649_v10, 2 }
 0x164   : > { %v596_v56 = vpop.f32.mrf.mxu0  ;;  %v2262_v35 = vpop.f32.mrf.mxu2 }
 0x165   : > { %2578 = vst [vmem:[#allocation36_spill] sm:$0xff] %v2262_v35  ;;  %v1013_v12 = vmul.f32 %v2143_v50, %v596_v56  ;;  %v805_v6 = vpop.f32.mrf.mxu1  ;;  %v2265_v51 = vpop.f32.mrf.mxu3  ;;  %v240_v56 = vperm.slane %v1660_v22, 2 }
 0x166   : > { %2579 = vst [vmem:[#allocation37_spill] sm:$0xff] %v2265_v51  ;;  %v1014_v39 = vmul.f32 %v2148_v0, %v805_v6  ;;  %v241_v6 = vperm.slane %v1660_v22, 6  ;;  %v232_v0 = vperm.slane %v1647_v8, 2 }
 0x167   : > { %v2268_v61 = vadd.f32 %v1013_v12, %v995_v19  ;;  %v2292_v19 = vperm.slane %v2108_v45, 3  ;;  %v227_v12 = vperm.slane %v1649_v10, 6  ;;  %v233_v10 = vperm.slane %v1647_v8, 6 }
 0x168   : > { %v2270_v46 = vadd.f32 %v1014_v39, %v996_v21  ;;  %v1069_v21 = vmul.f32 %v2281_v38, %v1844_v13  ;;  %v2299_v39 = vperm.slane %v2106_v57, 5  ;;  %v228_v13 = vperm.slane %v226_v26, 2 }
 0x169   : > { %2580 = vst [vmem:[#allocation38_spill] sm:$0xff] %v2268_v61  ;;  %v242_v61 = vperm.slane %v240_v56, 2  ;;  %v229_v51 = vperm.slane %v227_v12, 2  ;;  %v243_v11 = vperm.slane %v241_v6, 2  ;;  %v2319_v8 = vperm.slane %v2106_v57, 6 }
 0x16a   : > { %2581 = vst [vmem:[#allocation39_spill] sm:$0xff] %v2270_v46  ;;  %v1103_v35 = vmul.f32 %v2299_v39, %v1988_v63  ;;  %v236_v56 = vperm.slane %v232_v0, 2  ;;  %v237_v42 = vperm.slane %v233_v10, 2  ;;  %vm230_vm13 = vcmp.eq.s32.totalorder %v1656_v16, %v228_v13 }
 0x16b   : > { %vm244_vm14 = vcmp.eq.s32.totalorder %v1656_v16, %v242_v61  ;;  %vm231_vm15 = vcmp.eq.s32.totalorder %v1656_v16, %v229_v51  ;;  %vm245_vm0 = vcmp.eq.s32.totalorder %v1656_v16, %v243_v11 }
 0x16c   : > { %v2272_v44 = vpop.f32.mrf.mxu0  ;;  %v2274_v3 = vpop.f32.mrf.mxu2  ;;  %v239_v16 = vsel %vm231_vm15, %v237_v42, 0.0 }
 0x16d   : > { %2582 = vst [vmem:[#allocation40_spill] sm:$0xff] %v2272_v44  ;;  %v2276_v47 = vpop.f32.mrf.mxu1  ;;  %v2278_v55 = vpop.f32.mrf.mxu3 }
 0x16e   : > { %2583 = vst [vmem:[#allocation41_spill] sm:$0xff] %v2274_v3 }
 0x16f   : > { %2584 = vst [vmem:[#allocation42_spill] sm:$0xff] %v2276_v47  ;;  %v246_v47 = vperm.slane %v1644_v5, 2 }
 0x170   : > { %2585 = vst [vmem:[#allocation43_spill] sm:$0xff] %v2278_v55  ;;  %v1070_v55 = vmul.f32 %v2284_v32, %v1851_v17  ;;  %v2313_v17 = vperm.slane %v2108_v45, 5 }
 0x172   : > { %v1104_v63 = vmul.f32 %v2313_v17, %v1995_v2 }
 0x174   : > { %v602_v3 = vpop.f32.mrf.mxu0  ;;  %v2303_v46 = vpop.f32.mrf.mxu2 }
 0x175   : > { %2586 = vst [vmem:[#allocation44_spill] sm:$0xff] %v2303_v46  ;;  %v1035_v22 = vmul.f32 %v2287_v41, %v602_v3  ;;  %v811_v50 = vpop.f32.mrf.mxu1  ;;  %v2309_v44 = vpop.f32.mrf.mxu3  ;;  %v2322_v3 = vperm.slane %v2108_v45, 6 }
 0x176   : > { %2587 = vst [vmem:[#allocation45_spill] sm:$0xff] %v2309_v44  ;;  %v1036_v46 = vmul.f32 %v2292_v19, %v811_v50  ;;  %v250_v44 = vperm.slane %v246_v47, 2  ;;  %v251_v50 = vperm.slane %v247_v53, 2  ;;  %v238_v47 = vsel %vm230_vm13, %v236_v56, 0.0 }
 0x177   : > { %v1051_v26 = vadd.f32 %v1035_v22, %v2160_v33  ;;  %v1137_v33 = vmul.f32 %v2319_v8, %v2172_v49  ;;  %v2337_v53 = vperm.slane %v2106_v57, 7 }
 0x178   : > { %v1052_v5 = vadd.f32 %v1036_v46, %v2162_v37  ;;  %v1138_v37 = vmul.f32 %v2322_v3, %v2175_v48  ;;  %v252_v6 = vsel %vm244_vm14, %v250_v44, 0.0  ;;  %v253_v11 = vsel %vm245_vm0, %v251_v50, 0.0 }
 0x179   : > { %v1085_v54 = vadd.f32 %v1069_v21, %v1051_v26  ;;  %v1071_v48 = vmul.f32 %v2281_v38, %v1862_v20  ;;  %v1072_v44 = vmul.f32 %v2284_v32, %v1869_v24  ;;  %v2352_v13 = vadd.f32 %v253_v11, %v239_v16 }
 0x17a   : > { %v1086_v12 = vadd.f32 %v1070_v55, %v1052_v5  ;;  %v1105_v26 = vmul.f32 %v2299_v39, %v2006_v9  ;;  %v1106_v20 = vmul.f32 %v2313_v17, %v2013_v18  ;;  %v1139_v50 = vmul.f32 %v2319_v8, %v2190_v7 }
 0x17b   : > { %v1119_v0 = vadd.f32 %v1103_v35, %v1085_v54  ;;  %v2342_v54 = vperm.slane %v2108_v45, 7  ;;  %v2347_v35 = vadd.f32 %v252_v6, %v238_v47  ;;  %v1140_v24 = vmul.f32 %v2322_v3, %v2193_v36 }
 0x17c   : > { %v605_v46 = vpop.f32.mrf.mxu0  ;;  %v698_v61 = vpop.f32.mrf.mxu2  ;;  %v1120_v2 = vadd.f32 %v1104_v63, %v1086_v12  ;;  %v1204_v9 = vperm.slane %v2352_v13, 0  ;;  %v1210_v18 = vperm.slane %v2352_v13, 1  ;;  %v1073_v11 = vmul.f32 %v2281_v38, %v1880_v27 }
 0x17d   : > { %v1037_v55 = vmul.f32 %v2287_v41, %v605_v46  ;;  %v1153_v51 = vadd.f32 %v1137_v33, %v1119_v0  ;;  %v814_v21 = vpop.f32.mrf.mxu1  ;;  %v907_v10 = vpop.f32.mrf.mxu3  ;;  %v1171_v45 = vmul.f32 %v2337_v53, %v698_v61 }
 0x17e   : > { %v1038_v49 = vmul.f32 %v2292_v19, %v814_v21  ;;  %v1154_v22 = vadd.f32 %v1138_v37, %v1120_v2  ;;  %v1209_v37 = vperm.slane %v2347_v35, 1 }
 0x17f   : > { %v1053_v57 = vadd.f32 %v1037_v55, %v2178_v59  ;;  %v1172_v59 = vmul.f32 %v2342_v54, %v907_v10  ;;  %v1187_v46 = vadd.f32 %v1171_v45, %v1153_v51  ;;  %v1074_v51 = vmul.f32 %v2284_v32, %v1887_v30 }
 0x180   : > { %v1054_v42 = vadd.f32 %v1038_v49, %v2180_v1  ;;  %v1203_v1 = vperm.slane %v2347_v35, 0 }
 0x181   : > { %v1087_v5 = vadd.f32 %v1071_v48, %v1053_v57  ;;  %v1188_v2 = vadd.f32 %v1172_v59, %v1154_v22  ;;  %v1107_v22 = vmul.f32 %v2299_v39, %v2024_v28 }
 0x182   : > { %v1088_v56 = vadd.f32 %v1072_v44, %v1054_v42  ;;  %v1205_v44 = vmul.f32 %v1203_v1, %v1187_v46 }
 0x183   : > { %v1121_v63 = vadd.f32 %v1105_v26, %v1087_v5  ;;  %v2588_v5 = vld [vmem:[#allocation17_spill] sm:$0xff] }
 0x184   : > { %v608_v12 = vpop.f32.mrf.mxu0  ;;  %v701_v33 = vpop.f32.mrf.mxu2  ;;  %v1122_v0 = vadd.f32 %v1106_v20, %v1088_v56  ;;  %v1108_v45 = vmul.f32 %v2313_v17, %v2588_v5  ;;  %v1206_v20 = vmul.f32 %v1204_v9, %v1188_v2  ;;  %v1215_v9 = vperm.slane %v2347_v35, 2 }
 0x185   : > { %v1039_v47 = vmul.f32 %v2287_v41, %v608_v12  ;;  %v1155_v6 = vadd.f32 %v1139_v50, %v1121_v63  ;;  %v1173_v7 = vmul.f32 %v2337_v53, %v701_v33  ;;  %v817_v61 = vpop.f32.mrf.mxu1  ;;  %v910_v36 = vpop.f32.mrf.mxu3 }
 0x186   : > { %v1040_v55 = vmul.f32 %v2292_v19, %v817_v61  ;;  %v1156_v21 = vadd.f32 %v1140_v24, %v1122_v0  ;;  %v1174_v16 = vmul.f32 %v2342_v54, %v910_v36  ;;  %v2590_v36 = vld [vmem:[#allocation6_spill] sm:$0xff] }
 0x187   : > { %v1055_v10 = vadd.f32 %v1039_v47, %v2196_v62  ;;  %v1189_v49 = vadd.f32 %v1173_v7, %v1155_v6  ;;  %v1141_v62 = vmul.f32 %v2319_v8, %v2208_v15  ;;  %v2589_v47 = vld [vmem:[#allocation5_spill] sm:$0xff]  ;;  %v1076_v2 = vmul.f32 %v2284_v32, %v2590_v36 }
 0x188   : > { %v1056_v48 = vadd.f32 %v1040_v55, %v2198_v14  ;;  %v1190_v57 = vadd.f32 %v1174_v16, %v1156_v21  ;;  %v1142_v14 = vmul.f32 %v2322_v3, %v2211_v40  ;;  %v1216_v40 = vperm.slane %v2352_v13, 2  ;;  %v2591_v16 = vld [vmem:[#allocation18_spill] sm:$0xff] }
 0x189   : > { %v1089_v42 = vadd.f32 %v1073_v11, %v1055_v10  ;;  %v1211_v26 = vmul.f32 %v1209_v37, %v1189_v49  ;;  %v1075_v6 = vmul.f32 %v2281_v38, %v2589_v47  ;;  %v1109_v11 = vmul.f32 %v2299_v39, %v2591_v16  ;;  %v2596_v47 = vld [vmem:[#allocation21_spill] sm:$0xff] }
 0x18a   : > { %v1090_v27 = vadd.f32 %v1074_v51, %v1056_v48  ;;  %v1212_v56 = vmul.f32 %v1210_v18, %v1190_v57  ;;  %v2592_v51 = vld [vmem:[#allocation19_spill] sm:$0xff] }
 0x18b   : > { %v1213_v59 = vadd.f32 %v1211_v26, %v1205_v44  ;;  %v1123_v30 = vadd.f32 %v1107_v22, %v1089_v42  ;;  %v1110_v48 = vmul.f32 %v2313_v17, %v2592_v51  ;;  %v1144_v26 = vmul.f32 %v2322_v3, %v2229_v60 }
 0x18c   : > { %v1214_v50 = vadd.f32 %v1212_v56, %v1206_v20  ;;  %v611_v24 = vpop.f32.mrf.mxu0  ;;  %v704_v28 = vpop.f32.mrf.mxu2  ;;  %v1124_v1 = vadd.f32 %v1108_v45, %v1090_v27  ;;  %v1222_v60 = vperm.slane %v2352_v13, 3 }
 0x18d   : > { %v1041_v63 = vmul.f32 %v2287_v41, %v611_v24  ;;  %v1157_v12 = vadd.f32 %v1141_v62, %v1123_v30  ;;  %v1175_v33 = vmul.f32 %v2337_v53, %v704_v28  ;;  %v820_v37 = vpop.f32.mrf.mxu1  ;;  %v913_v0 = vpop.f32.mrf.mxu3  ;;  %v1221_v30 = vperm.slane %v2347_v35, 3 }
 0x18e   : > { %v1042_v15 = vmul.f32 %v2292_v19, %v820_v37  ;;  %v1158_v18 = vadd.f32 %v1142_v14, %v1124_v1  ;;  %v1176_v46 = vmul.f32 %v2342_v54, %v913_v0 }
 0x18f   : > { %v1057_v7 = vadd.f32 %v1041_v63, %v2214_v4  ;;  %v1191_v61 = vadd.f32 %v1175_v33, %v1157_v12  ;;  %v1143_v4 = vmul.f32 %v2319_v8, %v2226_v23  ;;  %v2594_v33 = vld [vmem:[#allocation8_spill] sm:$0xff] }
 0x190   : > { %v1058_v55 = vadd.f32 %v1042_v15, %v2216_v34  ;;  %v1192_v21 = vadd.f32 %v1176_v46, %v1158_v18  ;;  %v2595_v15 = vld [vmem:[#allocation20_spill] sm:$0xff] }
 0x191   : > { %v1091_v10 = vadd.f32 %v1075_v6, %v1057_v7  ;;  %v1217_v49 = vmul.f32 %v1215_v9, %v1191_v61  ;;  %v1078_v9 = vmul.f32 %v2284_v32, %v2594_v33  ;;  %v1111_v18 = vmul.f32 %v2299_v39, %v2595_v15  ;;  %v2604_v33 = vld [vmem:[#allocation24_spill] sm:$0xff] }
 0x192   : > { %v1092_v57 = vadd.f32 %v1076_v2, %v1058_v55  ;;  %v1218_v22 = vmul.f32 %v1216_v40, %v1192_v21  ;;  %v1112_v6 = vmul.f32 %v2313_v17, %v2596_v47  ;;  %v1146_v55 = vmul.f32 %v2322_v3, %v2247_v58 }
 0x193   : > { %v1219_v44 = vadd.f32 %v1217_v49, %v1213_v59  ;;  %v1125_v42 = vadd.f32 %v1109_v11, %v1091_v10  ;;  %v1228_v58 = vperm.slane %v2352_v13, 4 }
 0x194   : > { %v1220_v34 = vadd.f32 %v1218_v22, %v1214_v50  ;;  %v614_v5 = vpop.f32.mrf.mxu0  ;;  %v707_v45 = vpop.f32.mrf.mxu2  ;;  %v1126_v20 = vadd.f32 %v1110_v48, %v1092_v57  ;;  %v2593_v50 = vld [vmem:[#allocation7_spill] sm:$0xff]  ;;  %v1227_v48 = vperm.slane %v2347_v35, 4 }
 0x195   : > { %v1043_v27 = vmul.f32 %v2287_v41, %v614_v5  ;;  %v1159_v56 = vadd.f32 %v1143_v4, %v1125_v42  ;;  %v1177_v62 = vmul.f32 %v2337_v53, %v707_v45  ;;  %v823_v14 = vpop.f32.mrf.mxu1  ;;  %v916_v24 = vpop.f32.mrf.mxu3  ;;  %v1077_v1 = vmul.f32 %v2281_v38, %v2593_v50  ;;  %v2597_v42 = vld [vmem:[#allocation9_spill] sm:$0xff]  ;;  %v2598_v45 = vld [vmem:[#allocation10_spill] sm:$0xff] }
 0x196   : > { %v1044_v23 = vmul.f32 %v2292_v19, %v823_v14  ;;  %v1160_v59 = vadd.f32 %v1144_v26, %v1126_v20  ;;  %v1178_v28 = vmul.f32 %v2342_v54, %v916_v24  ;;  %v1079_v26 = vmul.f32 %v2281_v38, %v2597_v42  ;;  %v2601_v24 = vld [vmem:[#allocation22_spill] sm:$0xff] }
 0x197   : > { %v1059_v63 = vadd.f32 %v1043_v27, %v2232_v25  ;;  %v1193_v12 = vadd.f32 %v1177_v62, %v1159_v56  ;;  %v1145_v25 = vmul.f32 %v2319_v8, %v2244_v29  ;;  %v1080_v20 = vmul.f32 %v2284_v32, %v2598_v45  ;;  %v2599_v62 = vld [vmem:[#allocation11_spill] sm:$0xff]  ;;  %v2613_v42 = vld [vmem:[#allocation38_spill] sm:$0xff]  ;;  %v2615_v45 = vld [vmem:[#allocation32_spill] sm:$0xff] }
 0x198   : > { %v1060_v37 = vadd.f32 %v1044_v23, %v2234_v52  ;;  %v1194_v0 = vadd.f32 %v1178_v28, %v1160_v59  ;;  %v1113_v23 = vmul.f32 %v2299_v39, %v2601_v24 }
 0x199   : > { %v1093_v46 = vadd.f32 %v1077_v1, %v1059_v63  ;;  %v1223_v40 = vmul.f32 %v1221_v30, %v1193_v12  ;;  %v2600_v30 = vld [vmem:[#allocation30_spill] sm:$0xff]  ;;  %v2603_v1 = vld [vmem:[#allocation23_spill] sm:$0xff] }
 0x19a   : > { %v1094_v7 = vadd.f32 %v1078_v9, %v1060_v37  ;;  %v1224_v61 = vmul.f32 %v1222_v60, %v1194_v0  ;;  %v947_v14 = vmul.f32 %v2600_v30, %v2599_v62  ;;  %v2602_v60 = vld [vmem:[#allocation12_spill] sm:$0xff]  ;;  %v2605_v9 = vld [vmem:[#allocation26_spill] sm:$0xff]  ;;  %v2618_v30 = vld [vmem:[#allocation39_spill] sm:$0xff] }
 0x19b   : > { %v1225_v36 = vadd.f32 %v1223_v40, %v1219_v44  ;;  %v1127_v2 = vadd.f32 %v1111_v18, %v1093_v46  ;;  %v1081_v50 = vmul.f32 %v2281_v38, %v2602_v60  ;;  %v2606_v37 = vld [vmem:[#allocation36_spill] sm:$0xff]  ;;  %v2607_v46 = vld [vmem:[#allocation27_spill] sm:$0xff]  ;;  %v2608_v40 = vld [vmem:[#allocation29_spill] sm:$0xff] }
 0x19c   : > { %v1226_v52 = vadd.f32 %v1224_v61, %v1220_v34  ;;  %v617_v21 = vpop.f32.mrf.mxu0  ;;  %v710_v16 = vpop.f32.mrf.mxu2  ;;  %v1128_v11 = vadd.f32 %v1112_v6, %v1094_v7  ;;  %v1147_v0 = vmul.f32 %v2319_v8, %v2606_v37  ;;  %v982_v47 = vmul.f32 %v2608_v40, %v2607_v46  ;;  %v2609_v6 = vld [vmem:[#allocation37_spill] sm:$0xff]  ;;  %v2620_v60 = vld [vmem:[#allocation28_spill] sm:$0xff]  ;;  %v2622_v46 = vld [vmem:[#allocation43_spill] sm:$0xff] }
 0x19d   : > { %v1045_v10 = vmul.f32 %v2287_v41, %v617_v21  ;;  %v1161_v49 = vadd.f32 %v1145_v25, %v1127_v2  ;;  %v1179_v51 = vmul.f32 %v2337_v53, %v710_v16  ;;  %v826_v57 = vpop.f32.mrf.mxu1  ;;  %v919_v22 = vpop.f32.mrf.mxu3  ;;  %v1148_v7 = vmul.f32 %v2322_v3, %v2609_v6 }
 0x19e   : > { %v1046_v29 = vmul.f32 %v2292_v19, %v826_v57  ;;  %v1162_v4 = vadd.f32 %v1146_v55, %v1128_v11  ;;  %v1180_v44 = vmul.f32 %v2342_v54, %v919_v22  ;;  %v1234_v22 = vperm.slane %v2352_v13, 5 }
 0x19f   : > { %v1061_v34 = vadd.f32 %v1045_v10, %v2250_v43  ;;  %v1195_v5 = vadd.f32 %v1179_v51, %v1161_v49  ;;  %v1114_v43 = vmul.f32 %v2313_v17, %v2603_v1  ;;  %v1233_v10 = vperm.slane %v2347_v35, 5 }
 0x1a0   : > { %v1062_v27 = vadd.f32 %v1046_v29, %v2252_v31  ;;  %v1196_v56 = vadd.f32 %v1180_v44, %v1162_v4  ;;  %v981_v31 = vmul.f32 %v2605_v9, %v2604_v33  ;;  %v2611_v29 = vld [vmem:[#allocation31_spill] sm:$0xff]  ;;  %v2612_v44 = vld [vmem:[#allocation14_spill] sm:$0xff]  ;;  %v1116_v1 = vmul.f32 %v2313_v17, %v2620_v60 }
 0x1a1   : > { %v1095_v59 = vadd.f32 %v1079_v26, %v1061_v34  ;;  %v1229_v28 = vmul.f32 %v1227_v48, %v1195_v5  ;;  %v2614_v5 = vld [vmem:[#allocation40_spill] sm:$0xff]  ;;  %v1150_v40 = vmul.f32 %v2322_v3, %v2622_v46 }
 0x1a2   : > { %v1096_v63 = vadd.f32 %v1080_v20, %v1062_v27  ;;  %v1230_v12 = vmul.f32 %v1228_v58, %v1196_v56  ;;  %v1082_v58 = vmul.f32 %v2284_v32, %v2612_v44  ;;  %v1015_v20 = vmul.f32 %v2615_v45, %v2614_v5  ;;  %v2616_v27 = vld [vmem:[#allocation42_spill] sm:$0xff]  ;;  %v2617_v56 = vld [vmem:[#allocation33_spill] sm:$0xff] }
 0x1a3   : > { %v1231_v15 = vadd.f32 %v1229_v28, %v1225_v36  ;;  %v1129_v18 = vadd.f32 %v1113_v23, %v1095_v59  ;;  %v1016_v62 = vmul.f32 %v2617_v56, %v2616_v27  ;;  %v2619_v59 = vld [vmem:[#allocation25_spill] sm:$0xff] }
 0x1a4   : > { %v1232_v61 = vadd.f32 %v1230_v12, %v1226_v52  ;;  %v620_v25 = vpop.f32.mrf.mxu0  ;;  %v713_v2 = vpop.f32.mrf.mxu2  ;;  %v1130_v55 = vadd.f32 %v1114_v43, %v1096_v63  ;;  %v2610_v52 = vld [vmem:[#allocation13_spill] sm:$0xff]  ;;  %v1115_v28 = vmul.f32 %v2299_v39, %v2619_v59  ;;  %v997_v12 = vadd.f32 %v981_v31, %v947_v14 }
 0x1a5   : > { %v1047_v21 = vmul.f32 %v2287_v41, %v620_v25  ;;  %v1163_v16 = vadd.f32 %v1147_v0, %v1129_v18  ;;  %v1181_v11 = vmul.f32 %v2337_v53, %v713_v2  ;;  %v829_v49 = vpop.f32.mrf.mxu1  ;;  %v922_v36 = vpop.f32.mrf.mxu3  ;;  %v948_v4 = vmul.f32 %v2611_v29, %v2610_v52  ;;  %v2621_v0 = vld [vmem:[#allocation41_spill] sm:$0xff]  ;;  %v2624_v52 = vld [vmem:[#allocation16_spill] sm:$0xff] }
 0x1a6   : > { %v1048_v51 = vmul.f32 %v2292_v19, %v829_v49  ;;  %v1164_v48 = vadd.f32 %v1148_v7, %v1130_v55  ;;  %v1182_v57 = vmul.f32 %v2342_v54, %v922_v36  ;;  %v1149_v18 = vmul.f32 %v2319_v8, %v2621_v0 }
 0x1a7   : > { %v1063_v26 = vadd.f32 %v1047_v21, %v2613_v42  ;;  %v1197_v34 = vadd.f32 %v1181_v11, %v1163_v16  ;;  %v998_v33 = vadd.f32 %v982_v47, %v948_v4  ;;  %v1031_v25 = vadd.f32 %v1015_v20, %v997_v12  ;;  %v2627_v20 = vld [vmem:[#allocation44_spill] sm:$0xff] }
 0x1a8   : > { %v1064_v24 = vadd.f32 %v1048_v51, %v2618_v30  ;;  %v1198_v23 = vadd.f32 %v1182_v57, %v1164_v48  ;;  %v1239_v47 = vperm.slane %v2347_v35, 6  ;;  %v2623_v48 = vld [vmem:[#allocation15_spill] sm:$0xff]  ;;  %v1084_v29 = vmul.f32 %v2284_v32, %v2624_v52  ;;  %v2628_v32 = vld [vmem:[#allocation45_spill] sm:$0xff] }
 0x1a9   : > { %v1097_v43 = vadd.f32 %v1081_v50, %v1063_v26  ;;  %v1235_v63 = vmul.f32 %v1233_v10, %v1197_v34  ;;  %v1032_v2 = vadd.f32 %v1016_v62, %v998_v33  ;;  %v1083_v57 = vmul.f32 %v2281_v38, %v2623_v48  ;;  %v2626_v34 = vld [vmem:[#allocation35_spill] sm:$0xff] }
 0x1aa   : > { %v1098_v9 = vadd.f32 %v1082_v58, %v1064_v24  ;;  %v1236_v37 = vmul.f32 %v1234_v22, %v1198_v23  ;;  %v2625_v58 = vld [vmem:[#allocation34_spill] sm:$0xff]  ;;  %v1118_v5 = vmul.f32 %v2313_v17, %v2626_v34  ;;  %v1151_v27 = vmul.f32 %v2319_v8, %v2627_v20 }
 0x1ab   : > { %v1237_v6 = vadd.f32 %v1235_v63, %v1231_v15  ;;  %v1131_v7 = vadd.f32 %v1115_v28, %v1097_v43  ;;  %v1152_v30 = vmul.f32 %v2322_v3, %v2628_v32  ;;  %v1245_v17 = vperm.slane %v2347_v35, 7 }
 0x1ac   : > { %v1238_v55 = vadd.f32 %v1236_v37, %v1232_v61  ;;  %v623_v21 = vpop.f32.mrf.mxu0  ;;  %v716_v16 = vpop.f32.mrf.mxu2  ;;  %v1132_v11 = vadd.f32 %v1116_v1, %v1098_v9  ;;  %v1240_v61 = vperm.slane %v2352_v13, 6  ;;  %v1246_v43 = vperm.slane %v2352_v13, 7 }
 0x1ad   : > { %v1049_v50 = vmul.f32 %v2287_v41, %v623_v21  ;;  %v1165_v14 = vadd.f32 %v1149_v18, %v1131_v7  ;;  %v1183_v31 = vmul.f32 %v2337_v53, %v716_v16  ;;  %v832_v10 = vpop.f32.mrf.mxu1  ;;  %v925_v49 = vpop.f32.mrf.mxu3 }
 0x1ae   : > { %v1050_v36 = vmul.f32 %v2292_v19, %v832_v10  ;;  %v1166_v15 = vadd.f32 %v1150_v40, %v1132_v11  ;;  %v1184_v51 = vmul.f32 %v2342_v54, %v925_v49  ;;  %v1117_v19 = vmul.f32 %v2299_v39, %v2625_v58 }
 0x1af   : > { %v1065_v41 = vadd.f32 %v1049_v50, %v1031_v25  ;;  %v1199_v22 = vadd.f32 %v1183_v31, %v1165_v14 }
 0x1b0   : > { %v1066_v4 = vadd.f32 %v1050_v36, %v1032_v2  ;;  %v1200_v44 = vadd.f32 %v1184_v51, %v1166_v15 }
 0x1b1   : > { %v1099_v42 = vadd.f32 %v1083_v57, %v1065_v41  ;;  %v1241_v26 = vmul.f32 %v1239_v47, %v1199_v22 }
 0x1b2   : > { %v1100_v45 = vadd.f32 %v1084_v29, %v1066_v4  ;;  %v1242_v38 = vmul.f32 %v1240_v61, %v1200_v44 }
 0x1b3   : > { %v1243_v56 = vadd.f32 %v1241_v26, %v1237_v6  ;;  %v1133_v62 = vadd.f32 %v1117_v19, %v1099_v42 }
 0x1b4   : > { %v1244_v24 = vadd.f32 %v1242_v38, %v1238_v55  ;;  %v719_v39 = vpop.f32.mrf.mxu2  ;;  %v1134_v23 = vadd.f32 %v1118_v5, %v1100_v45 }
 0x1b5   : > { %v1167_v59 = vadd.f32 %v1151_v27, %v1133_v62  ;;  %v1185_v28 = vmul.f32 %v2337_v53, %v719_v39  ;;  %v928_v60 = vpop.f32.mrf.mxu3 }
 0x1b6   : > { %v1168_v1 = vadd.f32 %v1152_v30, %v1134_v23  ;;  %v1186_v8 = vmul.f32 %v2342_v54, %v928_v60 }
 0x1b7   : > { %v1201_v3 = vadd.f32 %v1185_v28, %v1167_v59 }
 0x1b8   : > { %v1202_v63 = vadd.f32 %v1186_v8, %v1168_v1 }
 0x1b9   : > { %v1247_v12 = vmul.f32 %v1245_v17, %v1201_v3 }
 0x1ba   : > { %v1248_v53 = vmul.f32 %v1246_v43, %v1202_v63 }
 0x1bb   : > { %v1249_v35 = vadd.f32 %v1247_v12, %v1243_v56 }
 0x1bc   : > { %v1250_v33 = vadd.f32 %v1248_v53, %v1244_v24 }
 0x1bd   : > { %1251 = vst [vmem:[%s137_s26] sm:$0xff] %v1249_v35 }
 0x1be   : > { %1252 = vst [vmem:[%s137_s26 + $0x8] sm:$0xff] %v1250_v33 }
 0x1bf   : > { %1540 = shalt.err (!%p1537_p3)
}
 0x1c0   : > { %1474 = dma.vmem_to_hbm [thread:$0]  (%p1630_p5), %s1268_s27, 256, %s1270_s28, %s1254_s29  }
 0x1c1 PF: > { %p1480_p4 = scmp.ge.s32.totalorder %s1575_s12, 2  ;;  %s1281_s14 = sand.u32 1, %s1563_s9  }
 0x1c2   : > { %s1282_s16 = scalar_lea.sflag [#allocation3], %s1281_s14 }
 0x1c3   : > { %p1477_p7 = pnand %p1480_p4, %p1634_p6 }
 0x1c5   : > { %p1478_p8 = pneg %p1477_p7 }
 0x1c7   : > { %1558 = dma.done.wait (%p1478_p8), %s1282_s16, 256  }
 0x1c8   : > { %1560 = vsyncadd (%p1478_p8), %s1282_s16, 4294967040  ;;  %p12_p9 = scmp.ge.s32.totalorder %s1617_s15, 4   ;;  %s2629_s9 = smov %s1567_s10 }
 0x1c9   : > { %s2630_s10 = smov %s1571_s11  ;;  %s2631_s11 = smov %s1628_s18 }
 0x1ca   : > { %s2632_s12 = smov %s1617_s15  ;;  %14 = sbr.rel (!%p12_p9) target bundleno = 3 (0x3), region = 63 }
 0x1cf   :  { %1288 = vsyncpa [#allocation3], 1 }
 0x1d0   :  { %1290 = vsyncpa [#allocation3 + $0x1], 1 }

</bundles_post_ra>
